<compile_context>
chip_gen: v7x
topology: tpu7x:2x2x1
jax: 0.10.0
libtpu: 0.0.40
codegen_flags: <defaults>
</compile_context>

<pallas_src>
import jax
import jax.numpy as jnp
import numpy as np
from jax.experimental import pallas as pl
from jax.experimental.pallas import tpu as pltpu


def _round_up(x, m):
    return (x + m - 1) // m * m


# 3x3 taps as (dh, dw) offsets, tap index t = kh*3 + kw.
_TAPS = tuple((kh - 1, kw - 1) for kh in range(3) for kw in range(3))


def _tap_masks(H, W):
    """(9, H*W) 0/1 masks: mask[t, h*W+w] == 1 iff (h+dh, w+dw) is inside."""
    h = np.arange(H)[:, None]
    w = np.arange(W)[None, :]
    masks = []
    for dh, dw in _TAPS:
        valid = (h + dh >= 0) & (h + dh < H) & (w + dw >= 0) & (w + dw < W)
        masks.append(valid.reshape(-1))
    return np.stack(masks).astype(np.float32)


def _make_double_conv_kernel(H, W, Cin_p, Cmid_p, Nb, compute_dtype):
    HW = H * W

    # For tap (dh, dw) with flat shift s = dh*W + dw, destination positions
    # p in [lo, hi) read source p + s; positions outside [lo, hi) always read
    # outside the image and stay zero.
    tap_geom = []
    for dh, dw in _TAPS:
        s = dh * W + dw
        tap_geom.append((s, max(0, -s), min(HW, HW - s)))

    def kernel(x_ref, masks_ref, w1_ref, b1_ref, w2_ref, b2_ref, o_ref,
               cols1_ref, cols2_ref, act1_ref):
        # x_ref:     (Nb, Cin_p, HW)    compute_dtype   flattened NCHW input
        # masks_ref: (9, HW)            compute_dtype   0/1 tap validity masks
        # w1_ref:    (Cmid_p, 9*Cin_p)  compute_dtype
        # b1_ref:    (Cmid_p, 1)        float32
        # w2_ref:    (Cout, 9*Cmid_p)   compute_dtype
        # b2_ref:    (Cout, 1)          float32
        # o_ref:     (Nb, Cout, HW)     float32
        # cols1_ref: (9*Cin_p, HW)      VMEM im2col scratch (conv1)
        # cols2_ref: (9*Cmid_p, HW)     VMEM im2col scratch (conv2)
        # act1_ref:  (Cmid_p, HW)       VMEM intermediate activation

        # Zero only the tiny never-overwritten boundary strips (<= W+1 lanes
        # per tap); the rest of the im2col buffers is fully rewritten below.
        for t, (s, lo, hi) in enumerate(tap_geom):
            if lo > 0:
                cols1_ref[t * Cin_p:(t + 1) * Cin_p, 0:lo] = (
                    jnp.zeros((Cin_p, lo), compute_dtype))
                cols2_ref[t * Cmid_p:(t + 1) * Cmid_p, 0:lo] = (
                    jnp.zeros((Cmid_p, lo), compute_dtype))
            if hi < HW:
                cols1_ref[t * Cin_p:(t + 1) * Cin_p, hi:HW] = (
                    jnp.zeros((Cin_p, HW - hi), compute_dtype))
                cols2_ref[t * Cmid_p:(t + 1) * Cmid_p, hi:HW] = (
                    jnp.zeros((Cmid_p, HW - hi), compute_dtype))

        w1 = w1_ref[...]
        b1 = b1_ref[...]
        w2 = w2_ref[...]
        b2 = b2_ref[...]

        for b in range(Nb):
            # ---- conv1: build im2col, one folded K = 9*Cin_p matmul ----
            for t, (s, lo, hi) in enumerate(tap_geom):
                src = x_ref[b, :, lo + s:hi + s]          # (Cin_p, hi-lo)
                m = masks_ref[t:t + 1, lo:hi]             # (1, hi-lo)
                cols1_ref[t * Cin_p:(t + 1) * Cin_p, lo:hi] = src * m
            y1 = jnp.dot(w1, cols1_ref[...],
                         preferred_element_type=jnp.float32)
            act1_ref[...] = jnp.maximum(y1 + b1, 0.0).astype(compute_dtype)

            # ---- conv2: im2col from the on-chip intermediate ----
            for t, (s, lo, hi) in enumerate(tap_geom):
                src = act1_ref[:, lo + s:hi + s]          # (Cmid_p, hi-lo)
                m = masks_ref[t:t + 1, lo:hi]
                cols2_ref[t * Cmid_p:(t + 1) * Cmid_p, lo:hi] = src * m
            y2 = jnp.dot(w2, cols2_ref[...],
                         preferred_element_type=jnp.float32)
            o_ref[b] = jnp.maximum(y2 + b2, 0.0).astype(o_ref.dtype)

    return kernel


def double_conv(x_nchw, w1, b1, w2, b2, *, compute_dtype=jnp.bfloat16):
    """Fused DoubleConv forward.

    x_nchw: (N, Cin, H, W) float32
    w1: (Cout, Cin, 3, 3), b1: (Cout,)     (PyTorch Conv2d OIHW layout)
    w2: (Cout, Cout, 3, 3), b2: (Cout,)
    returns (N, Cout, H, W) float32
    """
    N, Cin, H, W = x_nchw.shape
    Cout = w1.shape[0]
    HW = H * W

    pack = 16 if compute_dtype == jnp.bfloat16 else 8
    Cin_p = _round_up(Cin, pack)      # padded input channels
    Cmid_p = _round_up(Cout, pack)    # padded intermediate channels

    # Batch elements per grid step (amortize per-step pipeline overhead).
    Nb = max(d for d in range(1, min(N, 4) + 1) if N % d == 0)

    # ---- host-side parameter / layout prep (reshapes only; x stays NCHW) ----
    x_flat = x_nchw.reshape(N, Cin, HW)
    x_flat = jnp.pad(x_flat, ((0, 0), (0, Cin_p - Cin), (0, 0)))
    x_flat = x_flat.astype(compute_dtype)

    # conv1 weights: (Cout, Cin, 3, 3) -> (Cmid_p, 9*Cin_p); column = t*Cin_p + cin
    w1_t = jnp.transpose(w1, (2, 3, 1, 0))                            # (3,3,Cin,Cout)
    w1_p = jnp.zeros((3, 3, Cin_p, Cmid_p), w1.dtype)
    w1_p = w1_p.at[:, :, :Cin, :Cout].set(w1_t)
    w1_k = w1_p.reshape(9 * Cin_p, Cmid_p).T.astype(compute_dtype)    # (Cmid_p, 9*Cin_p)
    b1_k = jnp.zeros((Cmid_p, 1), jnp.float32)
    b1_k = b1_k.at[:Cout, 0].set(b1.astype(jnp.float32))

    # conv2 weights: (Cout, Cout, 3, 3) -> (Cout, 9*Cmid_p)
    w2_t = jnp.transpose(w2, (2, 3, 1, 0))                            # (3,3,Cout,Cout)
    w2_p = jnp.zeros((3, 3, Cmid_p, Cout), w2.dtype)
    w2_p = w2_p.at[:, :, :Cout, :].set(w2_t)
    w2_k = w2_p.reshape(9 * Cmid_p, Cout).T.astype(compute_dtype)     # (Cout, 9*Cmid_p)
    b2_k = b2.astype(jnp.float32).reshape(Cout, 1)

    masks = jnp.asarray(_tap_masks(H, W), dtype=compute_dtype)        # (9, HW)

    kernel = _make_double_conv_kernel(H, W, Cin_p, Cmid_p, Nb, compute_dtype)

    out_flat = pl.pallas_call(
        kernel,
        out_shape=jax.ShapeDtypeStruct((N, Cout, HW), jnp.float32),
        grid_spec=pltpu.PrefetchScalarGridSpec(
            num_scalar_prefetch=0,
            grid=(N // Nb,),
            in_specs=[
                pl.BlockSpec((Nb, Cin_p, HW), lambda n: (n, 0, 0)),
                pl.BlockSpec((9, HW), lambda n: (0, 0)),
                pl.BlockSpec((Cmid_p, 9 * Cin_p), lambda n: (0, 0)),
                pl.BlockSpec((Cmid_p, 1), lambda n: (0, 0)),
                pl.BlockSpec((Cout, 9 * Cmid_p), lambda n: (0, 0)),
                pl.BlockSpec((Cout, 1), lambda n: (0, 0)),
            ],
            out_specs=pl.BlockSpec((Nb, Cout, HW), lambda n: (n, 0, 0)),
            scratch_shapes=[
                pltpu.VMEM((9 * Cin_p, HW), compute_dtype),   # im2col conv1
                pltpu.VMEM((9 * Cmid_p, HW), compute_dtype),  # im2col conv2
                pltpu.VMEM((Cmid_p, HW), compute_dtype),      # intermediate act
            ],
        ),
        compiler_params=pltpu.CompilerParams(
            dimension_semantics=("parallel",)),
    )(x_flat, masks, w1_k, b1_k, w2_k, b2_k)

    return out_flat.reshape(N, Cout, H, W)


def ref_double_conv(x_nchw, w1, b1, w2, b2):
    dn = ("NCHW", "OIHW", "NCHW")
    y = jax.lax.conv_general_dilated(
        x_nchw, w1, (1, 1), ((1, 1), (1, 1)), dimension_numbers=dn)
    y = jnp.maximum(y + b1[None, :, None, None], 0.0)
    y = jax.lax.conv_general_dilated(
        y, w2, (1, 1), ((1, 1), (1, 1)), dimension_numbers=dn)
    y = jnp.maximum(y + b2[None, :, None, None], 0.0)
    return y


if __name__ == "__main__":
    N, Cin, Cout, H, W = 2, 4, 8, 16, 16

    key = jax.random.PRNGKey(0)
    kx, k1, kb1, k2, kb2 = jax.random.split(key, 5)
    x = jax.random.normal(kx, (N, Cin, H, W), jnp.float32)
    # deterministic synthetic parameters (PyTorch Conv2d weight layout OIHW)
    w1 = jax.random.normal(k1, (Cout, Cin, 3, 3), jnp.float32) * 0.1
    b1 = jax.random.normal(kb1, (Cout,), jnp.float32) * 0.1
    w2 = jax.random.normal(k2, (Cout, Cout, 3, 3), jnp.float32) * 0.1
    b2 = jax.random.normal(kb2, (Cout,), jnp.float32) * 0.1

    out = jax.block_until_ready(double_conv(x, w1, b1, w2, b2))
    ref = jax.block_until_ready(ref_double_conv(x, w1, b1, w2, b2))

    assert out.shape == (N, Cout, H, W)
    # bf16 inputs / f32 accumulation vs a full-f32 reference.
    assert jnp.allclose(out, ref, atol=3e-2, rtol=3e-2), "mismatch vs reference"

    print("KERNEL_OK")
</pallas_src>

<mosaic_0001>
module attributes {stable_mosaic.version = 11 : i64} {
  func.func @kernel(%arg0: i32, %arg1: memref<2x16x256xbf16, #tpu.memory_space<vmem>>, %arg2: memref<9x256xbf16, #tpu.memory_space<vmem>>, %arg3: memref<16x144xbf16, #tpu.memory_space<vmem>>, %arg4: memref<16x1xf32, #tpu.memory_space<vmem>>, %arg5: memref<8x144xbf16, #tpu.memory_space<vmem>>, %arg6: memref<8x1xf32, #tpu.memory_space<vmem>>, %arg7: memref<2x8x256xf32, #tpu.memory_space<vmem>>, %arg8: memref<144x256xbf16, #tpu.memory_space<vmem>>, %arg9: memref<144x256xbf16, #tpu.memory_space<vmem>>, %arg10: memref<16x256xbf16, #tpu.memory_space<vmem>>) attributes {dimension_semantics = [#tpu.dimension_semantics<parallel>], iteration_bounds = array<i64: 1>, scalar_prefetch = 0 : i64, scratch_operands = 3 : i64, tpu.core_type = #tpu.core_type<tc>, window_params = [{transform_indices = @transform_0, window_bounds = array<i64: 2, 16, 256>}, {pipeline_mode = #tpu.pipeline_mode<synchronous>, transform_indices = @transform_1, window_bounds = array<i64: 9, 256>}, {pipeline_mode = #tpu.pipeline_mode<synchronous>, transform_indices = @transform_2, window_bounds = array<i64: 16, 144>}, {pipeline_mode = #tpu.pipeline_mode<synchronous>, transform_indices = @transform_3, window_bounds = array<i64: 16, 1>}, {pipeline_mode = #tpu.pipeline_mode<synchronous>, transform_indices = @transform_4, window_bounds = array<i64: 8, 144>}, {pipeline_mode = #tpu.pipeline_mode<synchronous>, transform_indices = @transform_5, window_bounds = array<i64: 8, 1>}, {transform_indices = @transform_6, window_bounds = array<i64: 2, 8, 256>}]} {
    %cst = arith.constant 0.000000e+00 : bf16
    %0 = vector.broadcast %cst : bf16 to vector<16x17xbf16>
    %c0 = arith.constant 0 : index
    %c0_0 = arith.constant 0 : index
    %1 = vector.load %arg8[%c0, %c0_0] : memref<144x256xbf16, #tpu.memory_space<vmem>>, vector<16x17xbf16>
    tpu.vector_store %arg8[%c0, %c0_0], %0 {strides = array<i32>} : memref<144x256xbf16, #tpu.memory_space<vmem>>, vector<16x17xbf16>,
    %cst_1 = arith.constant 0.000000e+00 : bf16
    %2 = vector.broadcast %cst_1 : bf16 to vector<16x17xbf16>
    %c0_2 = arith.constant 0 : index
    %c0_3 = arith.constant 0 : index
    %3 = vector.load %arg9[%c0_2, %c0_3] : memref<144x256xbf16, #tpu.memory_space<vmem>>, vector<16x17xbf16>
    tpu.vector_store %arg9[%c0_2, %c0_3], %2 {strides = array<i32>} : memref<144x256xbf16, #tpu.memory_space<vmem>>, vector<16x17xbf16>,
    %cst_4 = arith.constant 0.000000e+00 : bf16
    %4 = vector.broadcast %cst_4 : bf16 to vector<16x16xbf16>
    %c16 = arith.constant 16 : index
    %c0_5 = arith.constant 0 : index
    %5 = vector.load %arg8[%c16, %c0_5] : memref<144x256xbf16, #tpu.memory_space<vmem>>, vector<16x16xbf16>
    tpu.vector_store %arg8[%c16, %c0_5], %4 {strides = array<i32>} : memref<144x256xbf16, #tpu.memory_space<vmem>>, vector<16x16xbf16>,
    %cst_6 = arith.constant 0.000000e+00 : bf16
    %6 = vector.broadcast %cst_6 : bf16 to vector<16x16xbf16>
    %c16_7 = arith.constant 16 : index
    %c0_8 = arith.constant 0 : index
    %7 = vector.load %arg9[%c16_7, %c0_8] : memref<144x256xbf16, #tpu.memory_space<vmem>>, vector<16x16xbf16>
    tpu.vector_store %arg9[%c16_7, %c0_8], %6 {strides = array<i32>} : memref<144x256xbf16, #tpu.memory_space<vmem>>, vector<16x16xbf16>,
    %cst_9 = arith.constant 0.000000e+00 : bf16
    %8 = vector.broadcast %cst_9 : bf16 to vector<16x15xbf16>
    %c32 = arith.constant 32 : index
    %c0_10 = arith.constant 0 : index
    %9 = vector.load %arg8[%c32, %c0_10] : memref<144x256xbf16, #tpu.memory_space<vmem>>, vector<16x15xbf16>
    tpu.vector_store %arg8[%c32, %c0_10], %8 {strides = array<i32>} : memref<144x256xbf16, #tpu.memory_space<vmem>>, vector<16x15xbf16>,
    %cst_11 = arith.constant 0.000000e+00 : bf16
    %10 = vector.broadcast %cst_11 : bf16 to vector<16x15xbf16>
    %c32_12 = arith.constant 32 : index
    %c0_13 = arith.constant 0 : index
    %11 = vector.load %arg9[%c32_12, %c0_13] : memref<144x256xbf16, #tpu.memory_space<vmem>>, vector<16x15xbf16>
    tpu.vector_store %arg9[%c32_12, %c0_13], %10 {strides = array<i32>} : memref<144x256xbf16, #tpu.memory_space<vmem>>, vector<16x15xbf16>,
    %cst_14 = arith.constant 0.000000e+00 : bf16
    %12 = vector.broadcast %cst_14 : bf16 to vector<16x1xbf16>
    %c48 = arith.constant 48 : index
    %c0_15 = arith.constant 0 : index
    %13 = vector.load %arg8[%c48, %c0_15] : memref<144x256xbf16, #tpu.memory_space<vmem>>, vector<16x1xbf16>
    tpu.vector_store %arg8[%c48, %c0_15], %12 {strides = array<i32>} : memref<144x256xbf16, #tpu.memory_space<vmem>>, vector<16x1xbf16>,
    %cst_16 = arith.constant 0.000000e+00 : bf16
    %14 = vector.broadcast %cst_16 : bf16 to vector<16x1xbf16>
    %c48_17 = arith.constant 48 : index
    %c0_18 = arith.constant 0 : index
    %15 = vector.load %arg9[%c48_17, %c0_18] : memref<144x256xbf16, #tpu.memory_space<vmem>>, vector<16x1xbf16>
    tpu.vector_store %arg9[%c48_17, %c0_18], %14 {strides = array<i32>} : memref<144x256xbf16, #tpu.memory_space<vmem>>, vector<16x1xbf16>,
    %cst_19 = arith.constant 0.000000e+00 : bf16
    %16 = vector.broadcast %cst_19 : bf16 to vector<16x1xbf16>
    %c80 = arith.constant 80 : index
    %c255 = arith.constant 255 : index
    %17 = vector.load %arg8[%c80, %c255] : memref<144x256xbf16, #tpu.memory_space<vmem>>, vector<16x1xbf16>
    tpu.vector_store %arg8[%c80, %c255], %16 {strides = array<i32>} : memref<144x256xbf16, #tpu.memory_space<vmem>>, vector<16x1xbf16>,
    %cst_20 = arith.constant 0.000000e+00 : bf16
    %18 = vector.broadcast %cst_20 : bf16 to vector<16x1xbf16>
    %c80_21 = arith.constant 80 : index
    %c255_22 = arith.constant 255 : index
    %19 = vector.load %arg9[%c80_21, %c255_22] : memref<144x256xbf16, #tpu.memory_space<vmem>>, vector<16x1xbf16>
    tpu.vector_store %arg9[%c80_21, %c255_22], %18 {strides = array<i32>} : memref<144x256xbf16, #tpu.memory_space<vmem>>, vector<16x1xbf16>,
    %cst_23 = arith.constant 0.000000e+00 : bf16
    %20 = vector.broadcast %cst_23 : bf16 to vector<16x15xbf16>
    %c96 = arith.constant 96 : index
    %c241 = arith.constant 241 : index
    %21 = vector.load %arg8[%c96, %c241] : memref<144x256xbf16, #tpu.memory_space<vmem>>, vector<16x15xbf16>
    tpu.vector_store %arg8[%c96, %c241], %20 {strides = array<i32>} : memref<144x256xbf16, #tpu.memory_space<vmem>>, vector<16x15xbf16>,
    %cst_24 = arith.constant 0.000000e+00 : bf16
    %22 = vector.broadcast %cst_24 : bf16 to vector<16x15xbf16>
    %c96_25 = arith.constant 96 : index
    %c241_26 = arith.constant 241 : index
    %23 = vector.load %arg9[%c96_25, %c241_26] : memref<144x256xbf16, #tpu.memory_space<vmem>>, vector<16x15xbf16>
    tpu.vector_store %arg9[%c96_25, %c241_26], %22 {strides = array<i32>} : memref<144x256xbf16, #tpu.memory_space<vmem>>, vector<16x15xbf16>,
    %cst_27 = arith.constant 0.000000e+00 : bf16
    %24 = vector.broadcast %cst_27 : bf16 to vector<16x16xbf16>
    %c112 = arith.constant 112 : index
    %c240 = arith.constant 240 : index
    %25 = vector.load %arg8[%c112, %c240] : memref<144x256xbf16, #tpu.memory_space<vmem>>, vector<16x16xbf16>
    tpu.vector_store %arg8[%c112, %c240], %24 {strides = array<i32>} : memref<144x256xbf16, #tpu.memory_space<vmem>>, vector<16x16xbf16>,
    %cst_28 = arith.constant 0.000000e+00 : bf16
    %26 = vector.broadcast %cst_28 : bf16 to vector<16x16xbf16>
    %c112_29 = arith.constant 112 : index
    %c240_30 = arith.constant 240 : index
    %27 = vector.load %arg9[%c112_29, %c240_30] : memref<144x256xbf16, #tpu.memory_space<vmem>>, vector<16x16xbf16>
    tpu.vector_store %arg9[%c112_29, %c240_30], %26 {strides = array<i32>} : memref<144x256xbf16, #tpu.memory_space<vmem>>, vector<16x16xbf16>,
    %cst_31 = arith.constant 0.000000e+00 : bf16
    %28 = vector.broadcast %cst_31 : bf16 to vector<16x17xbf16>
    %c128 = arith.constant 128 : index
    %c239 = arith.constant 239 : index
    %29 = vector.load %arg8[%c128, %c239] : memref<144x256xbf16, #tpu.memory_space<vmem>>, vector<16x17xbf16>
    tpu.vector_store %arg8[%c128, %c239], %28 {strides = array<i32>} : memref<144x256xbf16, #tpu.memory_space<vmem>>, vector<16x17xbf16>,
    %cst_32 = arith.constant 0.000000e+00 : bf16
    %30 = vector.broadcast %cst_32 : bf16 to vector<16x17xbf16>
    %c128_33 = arith.constant 128 : index
    %c239_34 = arith.constant 239 : index
    %31 = vector.load %arg9[%c128_33, %c239_34] : memref<144x256xbf16, #tpu.memory_space<vmem>>, vector<16x17xbf16>
    tpu.vector_store %arg9[%c128_33, %c239_34], %30 {strides = array<i32>} : memref<144x256xbf16, #tpu.memory_space<vmem>>, vector<16x17xbf16>,
    %c0_35 = arith.constant 0 : index
    %c0_36 = arith.constant 0 : index
    %32 = vector.load %arg3[%c0_35, %c0_36] : memref<16x144xbf16, #tpu.memory_space<vmem>>, vector<16x144xbf16>
    %c0_37 = arith.constant 0 : index
    %c0_38 = arith.constant 0 : index
    %33 = vector.load %arg4[%c0_37, %c0_38] : memref<16x1xf32, #tpu.memory_space<vmem>>, vector<16x1xf32>
    %c0_39 = arith.constant 0 : index
    %c0_40 = arith.constant 0 : index
    %34 = vector.load %arg5[%c0_39, %c0_40] : memref<8x144xbf16, #tpu.memory_space<vmem>>, vector<8x144xbf16>
    %c0_41 = arith.constant 0 : index
    %c0_42 = arith.constant 0 : index
    %35 = vector.load %arg6[%c0_41, %c0_42] : memref<8x1xf32, #tpu.memory_space<vmem>>, vector<8x1xf32>
    %c0_43 = arith.constant 0 : index
    %c0_44 = arith.constant 0 : index
    %c0_45 = arith.constant 0 : index
    %36 = vector.load %arg1[%c0_43, %c0_44, %c0_45] : memref<2x16x256xbf16, #tpu.memory_space<vmem>>, vector<1x16x239xbf16>
    %37 = vector.shape_cast %36 : vector<1x16x239xbf16> to vector<16x239xbf16>
    %c0_46 = arith.constant 0 : index
    %c17 = arith.constant 17 : index
    %38 = vector.load %arg2[%c0_46, %c17] : memref<9x256xbf16, #tpu.memory_space<vmem>>, vector<1x239xbf16>
    %39 = vector.broadcast %38 : vector<1x239xbf16> to vector<16x239xbf16>
    %40 = arith.mulf %37, %39 : vector<16x239xbf16>
    %c0_47 = arith.constant 0 : index
    %c17_48 = arith.constant 17 : index
    %41 = vector.load %arg8[%c0_47, %c17_48] : memref<144x256xbf16, #tpu.memory_space<vmem>>, vector<16x239xbf16>
    tpu.vector_store %arg8[%c0_47, %c17_48], %40 {strides = array<i32>} : memref<144x256xbf16, #tpu.memory_space<vmem>>, vector<16x239xbf16>,
    %c0_49 = arith.constant 0 : index
    %c0_50 = arith.constant 0 : index
    %c0_51 = arith.constant 0 : index
    %42 = vector.load %arg1[%c0_49, %c0_50, %c0_51] : memref<2x16x256xbf16, #tpu.memory_space<vmem>>, vector<1x16x240xbf16>
    %43 = vector.shape_cast %42 : vector<1x16x240xbf16> to vector<16x240xbf16>
    %c1 = arith.constant 1 : index
    %c16_52 = arith.constant 16 : index
    %44 = vector.load %arg2[%c1, %c16_52] : memref<9x256xbf16, #tpu.memory_space<vmem>>, vector<1x240xbf16>
    %45 = vector.broadcast %44 : vector<1x240xbf16> to vector<16x240xbf16>
    %46 = arith.mulf %43, %45 : vector<16x240xbf16>
    %c16_53 = arith.constant 16 : index
    %c16_54 = arith.constant 16 : index
    %47 = vector.load %arg8[%c16_53, %c16_54] : memref<144x256xbf16, #tpu.memory_space<vmem>>, vector<16x240xbf16>
    tpu.vector_store %arg8[%c16_53, %c16_54], %46 {strides = array<i32>} : memref<144x256xbf16, #tpu.memory_space<vmem>>, vector<16x240xbf16>,
    %c0_55 = arith.constant 0 : index
    %c0_56 = arith.constant 0 : index
    %c0_57 = arith.constant 0 : index
    %48 = vector.load %arg1[%c0_55, %c0_56, %c0_57] : memref<2x16x256xbf16, #tpu.memory_space<vmem>>, vector<1x16x241xbf16>
    %49 = vector.shape_cast %48 : vector<1x16x241xbf16> to vector<16x241xbf16>
    %c2 = arith.constant 2 : index
    %c15 = arith.constant 15 : index
    %50 = vector.load %arg2[%c2, %c15] : memref<9x256xbf16, #tpu.memory_space<vmem>>, vector<1x241xbf16>
    %51 = vector.broadcast %50 : vector<1x241xbf16> to vector<16x241xbf16>
    %52 = arith.mulf %49, %51 : vector<16x241xbf16>
    %c32_58 = arith.constant 32 : index
    %c15_59 = arith.constant 15 : index
    %53 = vector.load %arg8[%c32_58, %c15_59] : memref<144x256xbf16, #tpu.memory_space<vmem>>, vector<16x241xbf16>
    tpu.vector_store %arg8[%c32_58, %c15_59], %52 {strides = array<i32>} : memref<144x256xbf16, #tpu.memory_space<vmem>>, vector<16x241xbf16>,
    %c0_60 = arith.constant 0 : index
    %c0_61 = arith.constant 0 : index
    %c0_62 = arith.constant 0 : index
    %54 = vector.load %arg1[%c0_60, %c0_61, %c0_62] : memref<2x16x256xbf16, #tpu.memory_space<vmem>>, vector<1x16x255xbf16>
    %55 = vector.shape_cast %54 : vector<1x16x255xbf16> to vector<16x255xbf16>
    %c3 = arith.constant 3 : index
    %c1_63 = arith.constant 1 : index
    %56 = vector.load %arg2[%c3, %c1_63] : memref<9x256xbf16, #tpu.memory_space<vmem>>, vector<1x255xbf16>
    %57 = vector.broadcast %56 : vector<1x255xbf16> to vector<16x255xbf16>
    %58 = arith.mulf %55, %57 : vector<16x255xbf16>
    %c48_64 = arith.constant 48 : index
    %c1_65 = arith.constant 1 : index
    %59 = vector.load %arg8[%c48_64, %c1_65] : memref<144x256xbf16, #tpu.memory_space<vmem>>, vector<16x255xbf16>
    tpu.vector_store %arg8[%c48_64, %c1_65], %58 {strides = array<i32>} : memref<144x256xbf16, #tpu.memory_space<vmem>>, vector<16x255xbf16>,
    %c0_66 = arith.constant 0 : index
    %c0_67 = arith.constant 0 : index
    %c0_68 = arith.constant 0 : index
    %60 = vector.load %arg1[%c0_66, %c0_67, %c0_68] : memref<2x16x256xbf16, #tpu.memory_space<vmem>>, vector<1x16x256xbf16>
    %61 = vector.shape_cast %60 : vector<1x16x256xbf16> to vector<16x256xbf16>
    %c4 = arith.constant 4 : index
    %c0_69 = arith.constant 0 : index
    %62 = vector.load %arg2[%c4, %c0_69] : memref<9x256xbf16, #tpu.memory_space<vmem>>, vector<1x256xbf16>
    %63 = vector.broadcast %62 : vector<1x256xbf16> to vector<16x256xbf16>
    %64 = arith.mulf %61, %63 : vector<16x256xbf16>
    %c64 = arith.constant 64 : index
    %c0_70 = arith.constant 0 : index
    %65 = vector.load %arg8[%c64, %c0_70] : memref<144x256xbf16, #tpu.memory_space<vmem>>, vector<16x256xbf16>
    tpu.vector_store %arg8[%c64, %c0_70], %64 {strides = array<i32>} : memref<144x256xbf16, #tpu.memory_space<vmem>>, vector<16x256xbf16>,
    %c0_71 = arith.constant 0 : index
    %c0_72 = arith.constant 0 : index
    %c1_73 = arith.constant 1 : index
    %66 = vector.load %arg1[%c0_71, %c0_72, %c1_73] : memref<2x16x256xbf16, #tpu.memory_space<vmem>>, vector<1x16x255xbf16>
    %67 = vector.shape_cast %66 : vector<1x16x255xbf16> to vector<16x255xbf16>
    %c5 = arith.constant 5 : index
    %c0_74 = arith.constant 0 : index
    %68 = vector.load %arg2[%c5, %c0_74] : memref<9x256xbf16, #tpu.memory_space<vmem>>, vector<1x255xbf16>
    %69 = vector.broadcast %68 : vector<1x255xbf16> to vector<16x255xbf16>
    %70 = arith.mulf %67, %69 : vector<16x255xbf16>
    %c80_75 = arith.constant 80 : index
    %c0_76 = arith.constant 0 : index
    %71 = vector.load %arg8[%c80_75, %c0_76] : memref<144x256xbf16, #tpu.memory_space<vmem>>, vector<16x255xbf16>
    tpu.vector_store %arg8[%c80_75, %c0_76], %70 {strides = array<i32>} : memref<144x256xbf16, #tpu.memory_space<vmem>>, vector<16x255xbf16>,
    %c0_77 = arith.constant 0 : index
    %c0_78 = arith.constant 0 : index
    %c15_79 = arith.constant 15 : index
    %72 = vector.load %arg1[%c0_77, %c0_78, %c15_79] : memref<2x16x256xbf16, #tpu.memory_space<vmem>>, vector<1x16x241xbf16>
    %73 = vector.shape_cast %72 : vector<1x16x241xbf16> to vector<16x241xbf16>
    %c6 = arith.constant 6 : index
    %c0_80 = arith.constant 0 : index
    %74 = vector.load %arg2[%c6, %c0_80] : memref<9x256xbf16, #tpu.memory_space<vmem>>, vector<1x241xbf16>
    %75 = vector.broadcast %74 : vector<1x241xbf16> to vector<16x241xbf16>
    %76 = arith.mulf %73, %75 : vector<16x241xbf16>
    %c96_81 = arith.constant 96 : index
    %c0_82 = arith.constant 0 : index
    %77 = vector.load %arg8[%c96_81, %c0_82] : memref<144x256xbf16, #tpu.memory_space<vmem>>, vector<16x241xbf16>
    tpu.vector_store %arg8[%c96_81, %c0_82], %76 {strides = array<i32>} : memref<144x256xbf16, #tpu.memory_space<vmem>>, vector<16x241xbf16>,
    %c0_83 = arith.constant 0 : index
    %c0_84 = arith.constant 0 : index
    %c16_85 = arith.constant 16 : index
    %78 = vector.load %arg1[%c0_83, %c0_84, %c16_85] : memref<2x16x256xbf16, #tpu.memory_space<vmem>>, vector<1x16x240xbf16>
    %79 = vector.shape_cast %78 : vector<1x16x240xbf16> to vector<16x240xbf16>
    %c7 = arith.constant 7 : index
    %c0_86 = arith.constant 0 : index
    %80 = vector.load %arg2[%c7, %c0_86] : memref<9x256xbf16, #tpu.memory_space<vmem>>, vector<1x240xbf16>
    %81 = vector.broadcast %80 : vector<1x240xbf16> to vector<16x240xbf16>
    %82 = arith.mulf %79, %81 : vector<16x240xbf16>
    %c112_87 = arith.constant 112 : index
    %c0_88 = arith.constant 0 : index
    %83 = vector.load %arg8[%c112_87, %c0_88] : memref<144x256xbf16, #tpu.memory_space<vmem>>, vector<16x240xbf16>
    tpu.vector_store %arg8[%c112_87, %c0_88], %82 {strides = array<i32>} : memref<144x256xbf16, #tpu.memory_space<vmem>>, vector<16x240xbf16>,
    %c0_89 = arith.constant 0 : index
    %c0_90 = arith.constant 0 : index
    %c17_91 = arith.constant 17 : index
    %84 = vector.load %arg1[%c0_89, %c0_90, %c17_91] : memref<2x16x256xbf16, #tpu.memory_space<vmem>>, vector<1x16x239xbf16>
    %85 = vector.shape_cast %84 : vector<1x16x239xbf16> to vector<16x239xbf16>
    %c8 = arith.constant 8 : index
    %c0_92 = arith.constant 0 : index
    %86 = vector.load %arg2[%c8, %c0_92] : memref<9x256xbf16, #tpu.memory_space<vmem>>, vector<1x239xbf16>
    %87 = vector.broadcast %86 : vector<1x239xbf16> to vector<16x239xbf16>
    %88 = arith.mulf %85, %87 : vector<16x239xbf16>
    %c128_93 = arith.constant 128 : index
    %c0_94 = arith.constant 0 : index
    %89 = vector.load %arg8[%c128_93, %c0_94] : memref<144x256xbf16, #tpu.memory_space<vmem>>, vector<16x239xbf16>
    tpu.vector_store %arg8[%c128_93, %c0_94], %88 {strides = array<i32>} : memref<144x256xbf16, #tpu.memory_space<vmem>>, vector<16x239xbf16>,
    %c0_95 = arith.constant 0 : index
    %c0_96 = arith.constant 0 : index
    %90 = vector.load %arg8[%c0_95, %c0_96] : memref<144x256xbf16, #tpu.memory_space<vmem>>, vector<144x256xbf16>
    %cst_97 = arith.constant dense<0.000000e+00> : vector<16x256xf32>
    %91 = tpu.matmul %32, %90, %cst_97 {dimension_numbers = #tpu.dot_dimension_numbers<[1], [0], [0], [1], [0, 0, 1, 1], [], []>} : vector<16x144xbf16>, vector<144x256xbf16>, vector<16x256xf32> -> vector<16x256xf32>
    %92 = vector.broadcast %33 : vector<16x1xf32> to vector<16x256xf32>
    %93 = arith.addf %91, %92 : vector<16x256xf32>
    %cst_98 = arith.constant 0.000000e+00 : f32
    %94 = vector.broadcast %cst_98 : f32 to vector<16x256xf32>
    %95 = arith.maximumf %93, %94 : vector<16x256xf32>
    %96 = arith.truncf %95 : vector<16x256xf32> to vector<16x256xbf16>
    %c0_99 = arith.constant 0 : index
    %c0_100 = arith.constant 0 : index
    %97 = vector.load %arg10[%c0_99, %c0_100] : memref<16x256xbf16, #tpu.memory_space<vmem>>, vector<16x256xbf16>
    tpu.vector_store %arg10[%c0_99, %c0_100], %96 {strides = array<i32>} : memref<16x256xbf16, #tpu.memory_space<vmem>>, vector<16x256xbf16>,
    %c0_101 = arith.constant 0 : index
    %c0_102 = arith.constant 0 : index
    %98 = vector.load %arg10[%c0_101, %c0_102] : memref<16x256xbf16, #tpu.memory_space<vmem>>, vector<16x239xbf16>
    %c0_103 = arith.constant 0 : index
    %c17_104 = arith.constant 17 : index
    %99 = vector.load %arg2[%c0_103, %c17_104] : memref<9x256xbf16, #tpu.memory_space<vmem>>, vector<1x239xbf16>
    %100 = vector.broadcast %99 : vector<1x239xbf16> to vector<16x239xbf16>
    %101 = arith.mulf %98, %100 : vector<16x239xbf16>
    %c0_105 = arith.constant 0 : index
    %c17_106 = arith.constant 17 : index
    %102 = vector.load %arg9[%c0_105, %c17_106] : memref<144x256xbf16, #tpu.memory_space<vmem>>, vector<16x239xbf16>
    tpu.vector_store %arg9[%c0_105, %c17_106], %101 {strides = array<i32>} : memref<144x256xbf16, #tpu.memory_space<vmem>>, vector<16x239xbf16>,
    %c0_107 = arith.constant 0 : index
    %c0_108 = arith.constant 0 : index
    %103 = vector.load %arg10[%c0_107, %c0_108] : memref<16x256xbf16, #tpu.memory_space<vmem>>, vector<16x240xbf16>
    %c1_109 = arith.constant 1 : index
    %c16_110 = arith.constant 16 : index
    %104 = vector.load %arg2[%c1_109, %c16_110] : memref<9x256xbf16, #tpu.memory_space<vmem>>, vector<1x240xbf16>
    %105 = vector.broadcast %104 : vector<1x240xbf16> to vector<16x240xbf16>
    %106 = arith.mulf %103, %105 : vector<16x240xbf16>
    %c16_111 = arith.constant 16 : index
    %c16_112 = arith.constant 16 : index
    %107 = vector.load %arg9[%c16_111, %c16_112] : memref<144x256xbf16, #tpu.memory_space<vmem>>, vector<16x240xbf16>
    tpu.vector_store %arg9[%c16_111, %c16_112], %106 {strides = array<i32>} : memref<144x256xbf16, #tpu.memory_space<vmem>>, vector<16x240xbf16>,
    %c0_113 = arith.constant 0 : index
    %c0_114 = arith.constant 0 : index
    %108 = vector.load %arg10[%c0_113, %c0_114] : memref<16x256xbf16, #tpu.memory_space<vmem>>, vector<16x241xbf16>
    %c2_115 = arith.constant 2 : index
    %c15_116 = arith.constant 15 : index
    %109 = vector.load %arg2[%c2_115, %c15_116] : memref<9x256xbf16, #tpu.memory_space<vmem>>, vector<1x241xbf16>
    %110 = vector.broadcast %109 : vector<1x241xbf16> to vector<16x241xbf16>
    %111 = arith.mulf %108, %110 : vector<16x241xbf16>
    %c32_117 = arith.constant 32 : index
    %c15_118 = arith.constant 15 : index
    %112 = vector.load %arg9[%c32_117, %c15_118] : memref<144x256xbf16, #tpu.memory_space<vmem>>, vector<16x241xbf16>
    tpu.vector_store %arg9[%c32_117, %c15_118], %111 {strides = array<i32>} : memref<144x256xbf16, #tpu.memory_space<vmem>>, vector<16x241xbf16>,
    %c0_119 = arith.constant 0 : index
    %c0_120 = arith.constant 0 : index
    %113 = vector.load %arg10[%c0_119, %c0_120] : memref<16x256xbf16, #tpu.memory_space<vmem>>, vector<16x255xbf16>
    %c3_121 = arith.constant 3 : index
    %c1_122 = arith.constant 1 : index
    %114 = vector.load %arg2[%c3_121, %c1_122] : memref<9x256xbf16, #tpu.memory_space<vmem>>, vector<1x255xbf16>
    %115 = vector.broadcast %114 : vector<1x255xbf16> to vector<16x255xbf16>
    %116 = arith.mulf %113, %115 : vector<16x255xbf16>
    %c48_123 = arith.constant 48 : index
    %c1_124 = arith.constant 1 : index
    %117 = vector.load %arg9[%c48_123, %c1_124] : memref<144x256xbf16, #tpu.memory_space<vmem>>, vector<16x255xbf16>
    tpu.vector_store %arg9[%c48_123, %c1_124], %116 {strides = array<i32>} : memref<144x256xbf16, #tpu.memory_space<vmem>>, vector<16x255xbf16>,
    %c0_125 = arith.constant 0 : index
    %c0_126 = arith.constant 0 : index
    %118 = vector.load %arg10[%c0_125, %c0_126] : memref<16x256xbf16, #tpu.memory_space<vmem>>, vector<16x256xbf16>
    %c4_127 = arith.constant 4 : index
    %c0_128 = arith.constant 0 : index
    %119 = vector.load %arg2[%c4_127, %c0_128] : memref<9x256xbf16, #tpu.memory_space<vmem>>, vector<1x256xbf16>
    %120 = vector.broadcast %119 : vector<1x256xbf16> to vector<16x256xbf16>
    %121 = arith.mulf %118, %120 : vector<16x256xbf16>
    %c64_129 = arith.constant 64 : index
    %c0_130 = arith.constant 0 : index
    %122 = vector.load %arg9[%c64_129, %c0_130] : memref<144x256xbf16, #tpu.memory_space<vmem>>, vector<16x256xbf16>
    tpu.vector_store %arg9[%c64_129, %c0_130], %121 {strides = array<i32>} : memref<144x256xbf16, #tpu.memory_space<vmem>>, vector<16x256xbf16>,
    %c0_131 = arith.constant 0 : index
    %c1_132 = arith.constant 1 : index
    %123 = vector.load %arg10[%c0_131, %c1_132] : memref<16x256xbf16, #tpu.memory_space<vmem>>, vector<16x255xbf16>
    %c5_133 = arith.constant 5 : index
    %c0_134 = arith.constant 0 : index
    %124 = vector.load %arg2[%c5_133, %c0_134] : memref<9x256xbf16, #tpu.memory_space<vmem>>, vector<1x255xbf16>
    %125 = vector.broadcast %124 : vector<1x255xbf16> to vector<16x255xbf16>
    %126 = arith.mulf %123, %125 : vector<16x255xbf16>
    %c80_135 = arith.constant 80 : index
    %c0_136 = arith.constant 0 : index
    %127 = vector.load %arg9[%c80_135, %c0_136] : memref<144x256xbf16, #tpu.memory_space<vmem>>, vector<16x255xbf16>
    tpu.vector_store %arg9[%c80_135, %c0_136], %126 {strides = array<i32>} : memref<144x256xbf16, #tpu.memory_space<vmem>>, vector<16x255xbf16>,
    %c0_137 = arith.constant 0 : index
    %c15_138 = arith.constant 15 : index
    %128 = vector.load %arg10[%c0_137, %c15_138] : memref<16x256xbf16, #tpu.memory_space<vmem>>, vector<16x241xbf16>
    %c6_139 = arith.constant 6 : index
    %c0_140 = arith.constant 0 : index
    %129 = vector.load %arg2[%c6_139, %c0_140] : memref<9x256xbf16, #tpu.memory_space<vmem>>, vector<1x241xbf16>
    %130 = vector.broadcast %129 : vector<1x241xbf16> to vector<16x241xbf16>
    %131 = arith.mulf %128, %130 : vector<16x241xbf16>
    %c96_141 = arith.constant 96 : index
    %c0_142 = arith.constant 0 : index
    %132 = vector.load %arg9[%c96_141, %c0_142] : memref<144x256xbf16, #tpu.memory_space<vmem>>, vector<16x241xbf16>
    tpu.vector_store %arg9[%c96_141, %c0_142], %131 {strides = array<i32>} : memref<144x256xbf16, #tpu.memory_space<vmem>>, vector<16x241xbf16>,
    %c0_143 = arith.constant 0 : index
    %c16_144 = arith.constant 16 : index
    %133 = vector.load %arg10[%c0_143, %c16_144] : memref<16x256xbf16, #tpu.memory_space<vmem>>, vector<16x240xbf16>
    %c7_145 = arith.constant 7 : index
    %c0_146 = arith.constant 0 : index
    %134 = vector.load %arg2[%c7_145, %c0_146] : memref<9x256xbf16, #tpu.memory_space<vmem>>, vector<1x240xbf16>
    %135 = vector.broadcast %134 : vector<1x240xbf16> to vector<16x240xbf16>
    %136 = arith.mulf %133, %135 : vector<16x240xbf16>
    %c112_147 = arith.constant 112 : index
    %c0_148 = arith.constant 0 : index
    %137 = vector.load %arg9[%c112_147, %c0_148] : memref<144x256xbf16, #tpu.memory_space<vmem>>, vector<16x240xbf16>
    tpu.vector_store %arg9[%c112_147, %c0_148], %136 {strides = array<i32>} : memref<144x256xbf16, #tpu.memory_space<vmem>>, vector<16x240xbf16>,
    %c0_149 = arith.constant 0 : index
    %c17_150 = arith.constant 17 : index
    %138 = vector.load %arg10[%c0_149, %c17_150] : memref<16x256xbf16, #tpu.memory_space<vmem>>, vector<16x239xbf16>
    %c8_151 = arith.constant 8 : index
    %c0_152 = arith.constant 0 : index
    %139 = vector.load %arg2[%c8_151, %c0_152] : memref<9x256xbf16, #tpu.memory_space<vmem>>, vector<1x239xbf16>
    %140 = vector.broadcast %139 : vector<1x239xbf16> to vector<16x239xbf16>
    %141 = arith.mulf %138, %140 : vector<16x239xbf16>
    %c128_153 = arith.constant 128 : index
    %c0_154 = arith.constant 0 : index
    %142 = vector.load %arg9[%c128_153, %c0_154] : memref<144x256xbf16, #tpu.memory_space<vmem>>, vector<16x239xbf16>
    tpu.vector_store %arg9[%c128_153, %c0_154], %141 {strides = array<i32>} : memref<144x256xbf16, #tpu.memory_space<vmem>>, vector<16x239xbf16>,
    %c0_155 = arith.constant 0 : index
    %c0_156 = arith.constant 0 : index
    %143 = vector.load %arg9[%c0_155, %c0_156] : memref<144x256xbf16, #tpu.memory_space<vmem>>, vector<144x256xbf16>
    %cst_157 = arith.constant dense<0.000000e+00> : vector<8x256xf32>
    %144 = tpu.matmul %34, %143, %cst_157 {dimension_numbers = #tpu.dot_dimension_numbers<[1], [0], [0], [1], [0, 0, 1, 1], [], []>} : vector<8x144xbf16>, vector<144x256xbf16>, vector<8x256xf32> -> vector<8x256xf32>
    %145 = vector.broadcast %35 : vector<8x1xf32> to vector<8x256xf32>
    %146 = arith.addf %144, %145 : vector<8x256xf32>
    %cst_158 = arith.constant 0.000000e+00 : f32
    %147 = vector.broadcast %cst_158 : f32 to vector<8x256xf32>
    %148 = arith.maximumf %146, %147 : vector<8x256xf32>
    %c0_159 = arith.constant 0 : index
    %c0_160 = arith.constant 0 : index
    %c0_161 = arith.constant 0 : index
    %149 = vector.load %arg7[%c0_159, %c0_160, %c0_161] : memref<2x8x256xf32, #tpu.memory_space<vmem>>, vector<1x8x256xf32>
    %150 = vector.shape_cast %149 : vector<1x8x256xf32> to vector<8x256xf32>
    %151 = vector.shape_cast %148 : vector<8x256xf32> to vector<1x8x256xf32>
    tpu.vector_store %arg7[%c0_159, %c0_160, %c0_161], %151 {strides = array<i32>} : memref<2x8x256xf32, #tpu.memory_space<vmem>>, vector<1x8x256xf32>,
    %c1_162 = arith.constant 1 : index
    %c0_163 = arith.constant 0 : index
    %c0_164 = arith.constant 0 : index
    %152 = vector.load %arg1[%c1_162, %c0_163, %c0_164] : memref<2x16x256xbf16, #tpu.memory_space<vmem>>, vector<1x16x239xbf16>
    %153 = vector.shape_cast %152 : vector<1x16x239xbf16> to vector<16x239xbf16>
    %c0_165 = arith.constant 0 : index
    %c17_166 = arith.constant 17 : index
    %154 = vector.load %arg2[%c0_165, %c17_166] : memref<9x256xbf16, #tpu.memory_space<vmem>>, vector<1x239xbf16>
    %155 = vector.broadcast %154 : vector<1x239xbf16> to vector<16x239xbf16>
    %156 = arith.mulf %153, %155 : vector<16x239xbf16>
    %c0_167 = arith.constant 0 : index
    %c17_168 = arith.constant 17 : index
    %157 = vector.load %arg8[%c0_167, %c17_168] : memref<144x256xbf16, #tpu.memory_space<vmem>>, vector<16x239xbf16>
    tpu.vector_store %arg8[%c0_167, %c17_168], %156 {strides = array<i32>} : memref<144x256xbf16, #tpu.memory_space<vmem>>, vector<16x239xbf16>,
    %c1_169 = arith.constant 1 : index
    %c0_170 = arith.constant 0 : index
    %c0_171 = arith.constant 0 : index
    %158 = vector.load %arg1[%c1_169, %c0_170, %c0_171] : memref<2x16x256xbf16, #tpu.memory_space<vmem>>, vector<1x16x240xbf16>
    %159 = vector.shape_cast %158 : vector<1x16x240xbf16> to vector<16x240xbf16>
    %c1_172 = arith.constant 1 : index
    %c16_173 = arith.constant 16 : index
    %160 = vector.load %arg2[%c1_172, %c16_173] : memref<9x256xbf16, #tpu.memory_space<vmem>>, vector<1x240xbf16>
    %161 = vector.broadcast %160 : vector<1x240xbf16> to vector<16x240xbf16>
    %162 = arith.mulf %159, %161 : vector<16x240xbf16>
    %c16_174 = arith.constant 16 : index
    %c16_175 = arith.constant 16 : index
    %163 = vector.load %arg8[%c16_174, %c16_175] : memref<144x256xbf16, #tpu.memory_space<vmem>>, vector<16x240xbf16>
    tpu.vector_store %arg8[%c16_174, %c16_175], %162 {strides = array<i32>} : memref<144x256xbf16, #tpu.memory_space<vmem>>, vector<16x240xbf16>,
    %c1_176 = arith.constant 1 : index
    %c0_177 = arith.constant 0 : index
    %c0_178 = arith.constant 0 : index
    %164 = vector.load %arg1[%c1_176, %c0_177, %c0_178] : memref<2x16x256xbf16, #tpu.memory_space<vmem>>, vector<1x16x241xbf16>
    %165 = vector.shape_cast %164 : vector<1x16x241xbf16> to vector<16x241xbf16>
    %c2_179 = arith.constant 2 : index
    %c15_180 = arith.constant 15 : index
    %166 = vector.load %arg2[%c2_179, %c15_180] : memref<9x256xbf16, #tpu.memory_space<vmem>>, vector<1x241xbf16>
    %167 = vector.broadcast %166 : vector<1x241xbf16> to vector<16x241xbf16>
    %168 = arith.mulf %165, %167 : vector<16x241xbf16>
    %c32_181 = arith.constant 32 : index
    %c15_182 = arith.constant 15 : index
    %169 = vector.load %arg8[%c32_181, %c15_182] : memref<144x256xbf16, #tpu.memory_space<vmem>>, vector<16x241xbf16>
    tpu.vector_store %arg8[%c32_181, %c15_182], %168 {strides = array<i32>} : memref<144x256xbf16, #tpu.memory_space<vmem>>, vector<16x241xbf16>,
    %c1_183 = arith.constant 1 : index
    %c0_184 = arith.constant 0 : index
    %c0_185 = arith.constant 0 : index
    %170 = vector.load %arg1[%c1_183, %c0_184, %c0_185] : memref<2x16x256xbf16, #tpu.memory_space<vmem>>, vector<1x16x255xbf16>
    %171 = vector.shape_cast %170 : vector<1x16x255xbf16> to vector<16x255xbf16>
    %c3_186 = arith.constant 3 : index
    %c1_187 = arith.constant 1 : index
    %172 = vector.load %arg2[%c3_186, %c1_187] : memref<9x256xbf16, #tpu.memory_space<vmem>>, vector<1x255xbf16>
    %173 = vector.broadcast %172 : vector<1x255xbf16> to vector<16x255xbf16>
    %174 = arith.mulf %171, %173 : vector<16x255xbf16>
    %c48_188 = arith.constant 48 : index
    %c1_189 = arith.constant 1 : index
    %175 = vector.load %arg8[%c48_188, %c1_189] : memref<144x256xbf16, #tpu.memory_space<vmem>>, vector<16x255xbf16>
    tpu.vector_store %arg8[%c48_188, %c1_189], %174 {strides = array<i32>} : memref<144x256xbf16, #tpu.memory_space<vmem>>, vector<16x255xbf16>,
    %c1_190 = arith.constant 1 : index
    %c0_191 = arith.constant 0 : index
    %c0_192 = arith.constant 0 : index
    %176 = vector.load %arg1[%c1_190, %c0_191, %c0_192] : memref<2x16x256xbf16, #tpu.memory_space<vmem>>, vector<1x16x256xbf16>
    %177 = vector.shape_cast %176 : vector<1x16x256xbf16> to vector<16x256xbf16>
    %c4_193 = arith.constant 4 : index
    %c0_194 = arith.constant 0 : index
    %178 = vector.load %arg2[%c4_193, %c0_194] : memref<9x256xbf16, #tpu.memory_space<vmem>>, vector<1x256xbf16>
    %179 = vector.broadcast %178 : vector<1x256xbf16> to vector<16x256xbf16>
    %180 = arith.mulf %177, %179 : vector<16x256xbf16>
    %c64_195 = arith.constant 64 : index
    %c0_196 = arith.constant 0 : index
    %181 = vector.load %arg8[%c64_195, %c0_196] : memref<144x256xbf16, #tpu.memory_space<vmem>>, vector<16x256xbf16>
    tpu.vector_store %arg8[%c64_195, %c0_196], %180 {strides = array<i32>} : memref<144x256xbf16, #tpu.memory_space<vmem>>, vector<16x256xbf16>,
    %c1_197 = arith.constant 1 : index
    %c0_198 = arith.constant 0 : index
    %c1_199 = arith.constant 1 : index
    %182 = vector.load %arg1[%c1_197, %c0_198, %c1_199] : memref<2x16x256xbf16, #tpu.memory_space<vmem>>, vector<1x16x255xbf16>
    %183 = vector.shape_cast %182 : vector<1x16x255xbf16> to vector<16x255xbf16>
    %c5_200 = arith.constant 5 : index
    %c0_201 = arith.constant 0 : index
    %184 = vector.load %arg2[%c5_200, %c0_201] : memref<9x256xbf16, #tpu.memory_space<vmem>>, vector<1x255xbf16>
    %185 = vector.broadcast %184 : vector<1x255xbf16> to vector<16x255xbf16>
    %186 = arith.mulf %183, %185 : vector<16x255xbf16>
    %c80_202 = arith.constant 80 : index
    %c0_203 = arith.constant 0 : index
    %187 = vector.load %arg8[%c80_202, %c0_203] : memref<144x256xbf16, #tpu.memory_space<vmem>>, vector<16x255xbf16>
    tpu.vector_store %arg8[%c80_202, %c0_203], %186 {strides = array<i32>} : memref<144x256xbf16, #tpu.memory_space<vmem>>, vector<16x255xbf16>,
    %c1_204 = arith.constant 1 : index
    %c0_205 = arith.constant 0 : index
    %c15_206 = arith.constant 15 : index
    %188 = vector.load %arg1[%c1_204, %c0_205, %c15_206] : memref<2x16x256xbf16, #tpu.memory_space<vmem>>, vector<1x16x241xbf16>
    %189 = vector.shape_cast %188 : vector<1x16x241xbf16> to vector<16x241xbf16>
    %c6_207 = arith.constant 6 : index
    %c0_208 = arith.constant 0 : index
    %190 = vector.load %arg2[%c6_207, %c0_208] : memref<9x256xbf16, #tpu.memory_space<vmem>>, vector<1x241xbf16>
    %191 = vector.broadcast %190 : vector<1x241xbf16> to vector<16x241xbf16>
    %192 = arith.mulf %189, %191 : vector<16x241xbf16>
    %c96_209 = arith.constant 96 : index
    %c0_210 = arith.constant 0 : index
    %193 = vector.load %arg8[%c96_209, %c0_210] : memref<144x256xbf16, #tpu.memory_space<vmem>>, vector<16x241xbf16>
    tpu.vector_store %arg8[%c96_209, %c0_210], %192 {strides = array<i32>} : memref<144x256xbf16, #tpu.memory_space<vmem>>, vector<16x241xbf16>,
    %c1_211 = arith.constant 1 : index
    %c0_212 = arith.constant 0 : index
    %c16_213 = arith.constant 16 : index
    %194 = vector.load %arg1[%c1_211, %c0_212, %c16_213] : memref<2x16x256xbf16, #tpu.memory_space<vmem>>, vector<1x16x240xbf16>
    %195 = vector.shape_cast %194 : vector<1x16x240xbf16> to vector<16x240xbf16>
    %c7_214 = arith.constant 7 : index
    %c0_215 = arith.constant 0 : index
    %196 = vector.load %arg2[%c7_214, %c0_215] : memref<9x256xbf16, #tpu.memory_space<vmem>>, vector<1x240xbf16>
    %197 = vector.broadcast %196 : vector<1x240xbf16> to vector<16x240xbf16>
    %198 = arith.mulf %195, %197 : vector<16x240xbf16>
    %c112_216 = arith.constant 112 : index
    %c0_217 = arith.constant 0 : index
    %199 = vector.load %arg8[%c112_216, %c0_217] : memref<144x256xbf16, #tpu.memory_space<vmem>>, vector<16x240xbf16>
    tpu.vector_store %arg8[%c112_216, %c0_217], %198 {strides = array<i32>} : memref<144x256xbf16, #tpu.memory_space<vmem>>, vector<16x240xbf16>,
    %c1_218 = arith.constant 1 : index
    %c0_219 = arith.constant 0 : index
    %c17_220 = arith.constant 17 : index
    %200 = vector.load %arg1[%c1_218, %c0_219, %c17_220] : memref<2x16x256xbf16, #tpu.memory_space<vmem>>, vector<1x16x239xbf16>
    %201 = vector.shape_cast %200 : vector<1x16x239xbf16> to vector<16x239xbf16>
    %c8_221 = arith.constant 8 : index
    %c0_222 = arith.constant 0 : index
    %202 = vector.load %arg2[%c8_221, %c0_222] : memref<9x256xbf16, #tpu.memory_space<vmem>>, vector<1x239xbf16>
    %203 = vector.broadcast %202 : vector<1x239xbf16> to vector<16x239xbf16>
    %204 = arith.mulf %201, %203 : vector<16x239xbf16>
    %c128_223 = arith.constant 128 : index
    %c0_224 = arith.constant 0 : index
    %205 = vector.load %arg8[%c128_223, %c0_224] : memref<144x256xbf16, #tpu.memory_space<vmem>>, vector<16x239xbf16>
    tpu.vector_store %arg8[%c128_223, %c0_224], %204 {strides = array<i32>} : memref<144x256xbf16, #tpu.memory_space<vmem>>, vector<16x239xbf16>,
    %c0_225 = arith.constant 0 : index
    %c0_226 = arith.constant 0 : index
    %206 = vector.load %arg8[%c0_225, %c0_226] : memref<144x256xbf16, #tpu.memory_space<vmem>>, vector<144x256xbf16>
    %cst_227 = arith.constant dense<0.000000e+00> : vector<16x256xf32>
    %207 = tpu.matmul %32, %206, %cst_227 {dimension_numbers = #tpu.dot_dimension_numbers<[1], [0], [0], [1], [0, 0, 1, 1], [], []>} : vector<16x144xbf16>, vector<144x256xbf16>, vector<16x256xf32> -> vector<16x256xf32>
    %208 = vector.broadcast %33 : vector<16x1xf32> to vector<16x256xf32>
    %209 = arith.addf %207, %208 : vector<16x256xf32>
    %cst_228 = arith.constant 0.000000e+00 : f32
    %210 = vector.broadcast %cst_228 : f32 to vector<16x256xf32>
    %211 = arith.maximumf %209, %210 : vector<16x256xf32>
    %212 = arith.truncf %211 : vector<16x256xf32> to vector<16x256xbf16>
    %c0_229 = arith.constant 0 : index
    %c0_230 = arith.constant 0 : index
    %213 = vector.load %arg10[%c0_229, %c0_230] : memref<16x256xbf16, #tpu.memory_space<vmem>>, vector<16x256xbf16>
    tpu.vector_store %arg10[%c0_229, %c0_230], %212 {strides = array<i32>} : memref<16x256xbf16, #tpu.memory_space<vmem>>, vector<16x256xbf16>,
    %c0_231 = arith.constant 0 : index
    %c0_232 = arith.constant 0 : index
    %214 = vector.load %arg10[%c0_231, %c0_232] : memref<16x256xbf16, #tpu.memory_space<vmem>>, vector<16x239xbf16>
    %c0_233 = arith.constant 0 : index
    %c17_234 = arith.constant 17 : index
    %215 = vector.load %arg2[%c0_233, %c17_234] : memref<9x256xbf16, #tpu.memory_space<vmem>>, vector<1x239xbf16>
    %216 = vector.broadcast %215 : vector<1x239xbf16> to vector<16x239xbf16>
    %217 = arith.mulf %214, %216 : vector<16x239xbf16>
    %c0_235 = arith.constant 0 : index
    %c17_236 = arith.constant 17 : index
    %218 = vector.load %arg9[%c0_235, %c17_236] : memref<144x256xbf16, #tpu.memory_space<vmem>>, vector<16x239xbf16>
    tpu.vector_store %arg9[%c0_235, %c17_236], %217 {strides = array<i32>} : memref<144x256xbf16, #tpu.memory_space<vmem>>, vector<16x239xbf16>,
    %c0_237 = arith.constant 0 : index
    %c0_238 = arith.constant 0 : index
    %219 = vector.load %arg10[%c0_237, %c0_238] : memref<16x256xbf16, #tpu.memory_space<vmem>>, vector<16x240xbf16>
    %c1_239 = arith.constant 1 : index
    %c16_240 = arith.constant 16 : index
    %220 = vector.load %arg2[%c1_239, %c16_240] : memref<9x256xbf16, #tpu.memory_space<vmem>>, vector<1x240xbf16>
    %221 = vector.broadcast %220 : vector<1x240xbf16> to vector<16x240xbf16>
    %222 = arith.mulf %219, %221 : vector<16x240xbf16>
    %c16_241 = arith.constant 16 : index
    %c16_242 = arith.constant 16 : index
    %223 = vector.load %arg9[%c16_241, %c16_242] : memref<144x256xbf16, #tpu.memory_space<vmem>>, vector<16x240xbf16>
    tpu.vector_store %arg9[%c16_241, %c16_242], %222 {strides = array<i32>} : memref<144x256xbf16, #tpu.memory_space<vmem>>, vector<16x240xbf16>,
    %c0_243 = arith.constant 0 : index
    %c0_244 = arith.constant 0 : index
    %224 = vector.load %arg10[%c0_243, %c0_244] : memref<16x256xbf16, #tpu.memory_space<vmem>>, vector<16x241xbf16>
    %c2_245 = arith.constant 2 : index
    %c15_246 = arith.constant 15 : index
    %225 = vector.load %arg2[%c2_245, %c15_246] : memref<9x256xbf16, #tpu.memory_space<vmem>>, vector<1x241xbf16>
    %226 = vector.broadcast %225 : vector<1x241xbf16> to vector<16x241xbf16>
    %227 = arith.mulf %224, %226 : vector<16x241xbf16>
    %c32_247 = arith.constant 32 : index
    %c15_248 = arith.constant 15 : index
    %228 = vector.load %arg9[%c32_247, %c15_248] : memref<144x256xbf16, #tpu.memory_space<vmem>>, vector<16x241xbf16>
    tpu.vector_store %arg9[%c32_247, %c15_248], %227 {strides = array<i32>} : memref<144x256xbf16, #tpu.memory_space<vmem>>, vector<16x241xbf16>,
    %c0_249 = arith.constant 0 : index
    %c0_250 = arith.constant 0 : index
    %229 = vector.load %arg10[%c0_249, %c0_250] : memref<16x256xbf16, #tpu.memory_space<vmem>>, vector<16x255xbf16>
    %c3_251 = arith.constant 3 : index
    %c1_252 = arith.constant 1 : index
    %230 = vector.load %arg2[%c3_251, %c1_252] : memref<9x256xbf16, #tpu.memory_space<vmem>>, vector<1x255xbf16>
    %231 = vector.broadcast %230 : vector<1x255xbf16> to vector<16x255xbf16>
    %232 = arith.mulf %229, %231 : vector<16x255xbf16>
    %c48_253 = arith.constant 48 : index
    %c1_254 = arith.constant 1 : index
    %233 = vector.load %arg9[%c48_253, %c1_254] : memref<144x256xbf16, #tpu.memory_space<vmem>>, vector<16x255xbf16>
    tpu.vector_store %arg9[%c48_253, %c1_254], %232 {strides = array<i32>} : memref<144x256xbf16, #tpu.memory_space<vmem>>, vector<16x255xbf16>,
    %c0_255 = arith.constant 0 : index
    %c0_256 = arith.constant 0 : index
    %234 = vector.load %arg10[%c0_255, %c0_256] : memref<16x256xbf16, #tpu.memory_space<vmem>>, vector<16x256xbf16>
    %c4_257 = arith.constant 4 : index
    %c0_258 = arith.constant 0 : index
    %235 = vector.load %arg2[%c4_257, %c0_258] : memref<9x256xbf16, #tpu.memory_space<vmem>>, vector<1x256xbf16>
    %236 = vector.broadcast %235 : vector<1x256xbf16> to vector<16x256xbf16>
    %237 = arith.mulf %234, %236 : vector<16x256xbf16>
    %c64_259 = arith.constant 64 : index
    %c0_260 = arith.constant 0 : index
    %238 = vector.load %arg9[%c64_259, %c0_260] : memref<144x256xbf16, #tpu.memory_space<vmem>>, vector<16x256xbf16>
    tpu.vector_store %arg9[%c64_259, %c0_260], %237 {strides = array<i32>} : memref<144x256xbf16, #tpu.memory_space<vmem>>, vector<16x256xbf16>,
    %c0_261 = arith.constant 0 : index
    %c1_262 = arith.constant 1 : index
    %239 = vector.load %arg10[%c0_261, %c1_262] : memref<16x256xbf16, #tpu.memory_space<vmem>>, vector<16x255xbf16>
    %c5_263 = arith.constant 5 : index
    %c0_264 = arith.constant 0 : index
    %240 = vector.load %arg2[%c5_263, %c0_264] : memref<9x256xbf16, #tpu.memory_space<vmem>>, vector<1x255xbf16>
    %241 = vector.broadcast %240 : vector<1x255xbf16> to vector<16x255xbf16>
    %242 = arith.mulf %239, %241 : vector<16x255xbf16>
    %c80_265 = arith.constant 80 : index
    %c0_266 = arith.constant 0 : index
    %243 = vector.load %arg9[%c80_265, %c0_266] : memref<144x256xbf16, #tpu.memory_space<vmem>>, vector<16x255xbf16>
    tpu.vector_store %arg9[%c80_265, %c0_266], %242 {strides = array<i32>} : memref<144x256xbf16, #tpu.memory_space<vmem>>, vector<16x255xbf16>,
    %c0_267 = arith.constant 0 : index
    %c15_268 = arith.constant 15 : index
    %244 = vector.load %arg10[%c0_267, %c15_268] : memref<16x256xbf16, #tpu.memory_space<vmem>>, vector<16x241xbf16>
    %c6_269 = arith.constant 6 : index
    %c0_270 = arith.constant 0 : index
    %245 = vector.load %arg2[%c6_269, %c0_270] : memref<9x256xbf16, #tpu.memory_space<vmem>>, vector<1x241xbf16>
    %246 = vector.broadcast %245 : vector<1x241xbf16> to vector<16x241xbf16>
    %247 = arith.mulf %244, %246 : vector<16x241xbf16>
    %c96_271 = arith.constant 96 : index
    %c0_272 = arith.constant 0 : index
    %248 = vector.load %arg9[%c96_271, %c0_272] : memref<144x256xbf16, #tpu.memory_space<vmem>>, vector<16x241xbf16>
    tpu.vector_store %arg9[%c96_271, %c0_272], %247 {strides = array<i32>} : memref<144x256xbf16, #tpu.memory_space<vmem>>, vector<16x241xbf16>,
    %c0_273 = arith.constant 0 : index
    %c16_274 = arith.constant 16 : index
    %249 = vector.load %arg10[%c0_273, %c16_274] : memref<16x256xbf16, #tpu.memory_space<vmem>>, vector<16x240xbf16>
    %c7_275 = arith.constant 7 : index
    %c0_276 = arith.constant 0 : index
    %250 = vector.load %arg2[%c7_275, %c0_276] : memref<9x256xbf16, #tpu.memory_space<vmem>>, vector<1x240xbf16>
    %251 = vector.broadcast %250 : vector<1x240xbf16> to vector<16x240xbf16>
    %252 = arith.mulf %249, %251 : vector<16x240xbf16>
    %c112_277 = arith.constant 112 : index
    %c0_278 = arith.constant 0 : index
    %253 = vector.load %arg9[%c112_277, %c0_278] : memref<144x256xbf16, #tpu.memory_space<vmem>>, vector<16x240xbf16>
    tpu.vector_store %arg9[%c112_277, %c0_278], %252 {strides = array<i32>} : memref<144x256xbf16, #tpu.memory_space<vmem>>, vector<16x240xbf16>,
    %c0_279 = arith.constant 0 : index
    %c17_280 = arith.constant 17 : index
    %254 = vector.load %arg10[%c0_279, %c17_280] : memref<16x256xbf16, #tpu.memory_space<vmem>>, vector<16x239xbf16>
    %c8_281 = arith.constant 8 : index
    %c0_282 = arith.constant 0 : index
    %255 = vector.load %arg2[%c8_281, %c0_282] : memref<9x256xbf16, #tpu.memory_space<vmem>>, vector<1x239xbf16>
    %256 = vector.broadcast %255 : vector<1x239xbf16> to vector<16x239xbf16>
    %257 = arith.mulf %254, %256 : vector<16x239xbf16>
    %c128_283 = arith.constant 128 : index
    %c0_284 = arith.constant 0 : index
    %258 = vector.load %arg9[%c128_283, %c0_284] : memref<144x256xbf16, #tpu.memory_space<vmem>>, vector<16x239xbf16>
    tpu.vector_store %arg9[%c128_283, %c0_284], %257 {strides = array<i32>} : memref<144x256xbf16, #tpu.memory_space<vmem>>, vector<16x239xbf16>,
    %c0_285 = arith.constant 0 : index
    %c0_286 = arith.constant 0 : index
    %259 = vector.load %arg9[%c0_285, %c0_286] : memref<144x256xbf16, #tpu.memory_space<vmem>>, vector<144x256xbf16>
    %cst_287 = arith.constant dense<0.000000e+00> : vector<8x256xf32>
    %260 = tpu.matmul %34, %259, %cst_287 {dimension_numbers = #tpu.dot_dimension_numbers<[1], [0], [0], [1], [0, 0, 1, 1], [], []>} : vector<8x144xbf16>, vector<144x256xbf16>, vector<8x256xf32> -> vector<8x256xf32>
    %261 = vector.broadcast %35 : vector<8x1xf32> to vector<8x256xf32>
    %262 = arith.addf %260, %261 : vector<8x256xf32>
    %cst_288 = arith.constant 0.000000e+00 : f32
    %263 = vector.broadcast %cst_288 : f32 to vector<8x256xf32>
    %264 = arith.maximumf %262, %263 : vector<8x256xf32>
    %c1_289 = arith.constant 1 : index
    %c0_290 = arith.constant 0 : index
    %c0_291 = arith.constant 0 : index
    %265 = vector.load %arg7[%c1_289, %c0_290, %c0_291] : memref<2x8x256xf32, #tpu.memory_space<vmem>>, vector<1x8x256xf32>
    %266 = vector.shape_cast %265 : vector<1x8x256xf32> to vector<8x256xf32>
    %267 = vector.shape_cast %264 : vector<8x256xf32> to vector<1x8x256xf32>
    tpu.vector_store %arg7[%c1_289, %c0_290, %c0_291], %267 {strides = array<i32>} : memref<2x8x256xf32, #tpu.memory_space<vmem>>, vector<1x8x256xf32>,
    return
  }
  func.func @transform_0(%arg0: i32) -> (i32, i32, i32) {
    %c0_i32 = arith.constant 0 : i32
    %c0_i32_0 = arith.constant 0 : i32
    %c0_i32_1 = arith.constant 0 : i32
    return %arg0, %c0_i32, %c0_i32_0 : i32, i32, i32
  }
  func.func @transform_1(%arg0: i32) -> (i32, i32) {
    %c0_i32 = arith.constant 0 : i32
    %c0_i32_0 = arith.constant 0 : i32
    %c0_i32_1 = arith.constant 0 : i32
    return %c0_i32, %c0_i32_0 : i32, i32
  }
  func.func @transform_2(%arg0: i32) -> (i32, i32) {
    %c0_i32 = arith.constant 0 : i32
    %c0_i32_0 = arith.constant 0 : i32
    %c0_i32_1 = arith.constant 0 : i32
    return %c0_i32, %c0_i32_0 : i32, i32
  }
  func.func @transform_3(%arg0: i32) -> (i32, i32) {
    %c0_i32 = arith.constant 0 : i32
    %c0_i32_0 = arith.constant 0 : i32
    %c0_i32_1 = arith.constant 0 : i32
    return %c0_i32, %c0_i32_0 : i32, i32
  }
  func.func @transform_4(%arg0: i32) -> (i32, i32) {
    %c0_i32 = arith.constant 0 : i32
    %c0_i32_0 = arith.constant 0 : i32
    %c0_i32_1 = arith.constant 0 : i32
    return %c0_i32, %c0_i32_0 : i32, i32
  }
  func.func @transform_5(%arg0: i32) -> (i32, i32) {
    %c0_i32 = arith.constant 0 : i32
    %c0_i32_0 = arith.constant 0 : i32
    %c0_i32_1 = arith.constant 0 : i32
    return %c0_i32, %c0_i32_0 : i32, i32
  }
  func.func @transform_6(%arg0: i32) -> (i32, i32, i32) {
    %c0_i32 = arith.constant 0 : i32
    %c0_i32_0 = arith.constant 0 : i32
    %c0_i32_1 = arith.constant 0 : i32
    return %arg0, %c0_i32, %c0_i32_0 : i32, i32, i32
  }
}

</mosaic_0001>

<bundles_post_ra>
// kernel: tpu_custom_call.1
= control target key start
LH: loop header
LB: loop body
LE: loop exit
PB: predicated region body
PF: predicated region fallthrough
CT: control target
= control target key end

     0   :  { %11 = vsyncpa [#allocation6], 0  ;;  %s3039_s0 = inlined_call_operand.hbm [shape: bf16[2,16,256], index: 0, kind: input, shape index: {}]   ;;  %s3040_s1 = inlined_call_operand.vmem [shape: bf16[9,256], index: 1, kind: input, shape index: {}]   ;;  %s3041_s2 = inlined_call_operand.vmem [shape: bf16[16,144], index: 2, kind: input, shape index: {}]   ;;  %s3042_s3 = inlined_call_operand.vmem [shape: f32[16,1], index: 3, kind: input, shape index: {}]   ;;  %s3043_s4 = inlined_call_operand.vmem [shape: bf16[8,144], index: 4, kind: input, shape index: {}]   ;;  %s3044_s5 = inlined_call_operand.vmem [shape: f32[8,1], index: 5, kind: input, shape index: {}]   ;;  %s3045_s6 = inlined_call_operand.hbm [shape: f32[2,8,256], index: 6, kind: output, shape index: {}]  }
   0x1   :  { %12 = vsyncpa [#allocation7], 0  ;;  %s2367_s21 = smov [#allocation5]   ;;  %s2319_s25 = scalar_lea.hbm %s3039_s0, 512 }
   0x2   :  { %s18_s22 = sshll.u32 %s2367_s21, 4  ;;  %p2320_p0 = scmp.ne.s32.totalorder %s3039_s0, %s2319_s25  ;;  %s19_s22 = int_to_ptr.vmem [resolvable:$true] %s18_s22 }
   0x3   :  { %p2323_p1 = scmp.lt.u32.totalorder %s2319_s25, %s3039_s0 }
   0x5   :  { %p2325_p2 = pnand %p2323_p1, %p2320_p0 }
   0x7   :  { %2328 = shalt.err (!%p2325_p2)
}
   0x8   :  { %s2329_s30 = scalar_lea.vmem %s19_s22, 512  ;;  %p2334_p4 = scmp.lt.s32.totalorder %s19_s22, %s19_s22 }
   0x9   :  { %p2330_p3 = scmp.ne.s32.totalorder %s19_s22, %s2329_s30  ;;  %p2335_p5 = scmp.lt.s32.totalorder %s2329_s30, %s2329_s30 }
   0xb   :  { %p2336_p6 = por %p2335_p5, %p2334_p4 }
   0xd   :  { %p2337_p7 = pnand %p2336_p6, %p2330_p3 }
   0xf   :  { %2340 = shalt.err (!%p2337_p7)
}
  0x10   :  { %s2368_s7 = smov 128   ;;  %s2369_s8 = smov 8  }
  0x11   :  { %24 = dma.hbm_to_vmem [thread:$0]  %s3039_s0, 512, %s19_s22, [#allocation6], %s2368_s7, %s2368_s7, %s2369_s8  }
  0x12   :  { %2363 = dma.done.wait [#allocation6], 512  }
  0x13   :  { %2364 = vsyncadd [#allocation6], 4294966784  ;;  %v80_v0 = vlaneseq  ;;  %v71_v6 = vld [vmem:[%s3040_s1] sm:$0x11]  ;;  %v181_v8 = vld [vmem:[%s3040_s1] sm:$0x22] }
  0x14   :  { %v125_v7 = vld [vmem:[%s3040_s1] sm:$0x11]  ;;  %v2092_v9 = vcombine.low %v71_v6, %v71_v6  ;;  %v2093_v10 = vcombine.high %v71_v6, %v71_v6  ;;  %v235_v13 = vld [vmem:[%s3040_s1] sm:$0x22]  ;;  %v2102_v14 = vcombine.low %v181_v8, %v181_v8  ;;  %v2103_v15 = vcombine.high %v181_v8, %v181_v8  ;;  %v333_v26 = vld [vmem:[%s3040_s1] sm:$0x44] }
  0x15   :  { %v81_v1 = vshrl.u32 %v80_v0, 7  ;;  %v2097_v11 = vcombine.low %v125_v7, %v125_v7  ;;  %v2098_v12 = vcombine.high %v125_v7, %v125_v7  ;;  %v2107_v16 = vcombine.low %v235_v13, %v235_v13  ;;  %v387_v35 = vld [vmem:[%s3040_s1] sm:$0x88]  ;;  %v493_v45 = vld [vmem:[%s3040_s1 + $0x8] sm:$0x11]  ;;  %s2370_s26 = smov 111  }
  0x16   :  { %v2108_v17 = vcombine.high %v235_v13, %v235_v13  ;;  %v78_v18 = vpack.i.b16 %v2092_v9, %v2092_v9  ;;  %v85_v19 = vpack.i.b16 %v2093_v10, %v2093_v10  ;;  %v188_v22 = vpack.i.b16 %v2102_v14, %v2102_v14  ;;  %v439_v40 = vld [vmem:[%s3040_s1] sm:$0x88]  ;;  %s2371_s27 = smov 113   ;;  %v1100_v62 = vld [vmem:[%s3040_s1] sm:$0x11]  ;;  %s2372_s30 = smov 112  }
  0x17   :  { %v2428_v2 = vsub.s32 0, %v81_v1  ;;  %v2430_v3 = vsub.s32 1, %v81_v1  ;;  %v2432_v4 = vsub.s32 2, %v81_v1  ;;  %v2434_v5 = vsub.s32 3, %v81_v1  ;;  %s2373_s7 = smov 127   ;;  %s2374_s14 = smov 1  }
  0x18   :  { %v132_v20 = vshrl.u32 %v2097_v11, 16  ;;  %v140_v21 = vshrl.u32 %v2098_v12, 16  ;;  %v195_v23 = vpack.i.b16 %v2103_v15, %v2103_v15  ;;  %v242_v24 = vshrl.u32 %v2107_v16, 16  ;;  %v1151_v11 = vld [vmem:[%s3040_s1] sm:$0x11]  ;;  %s2375_s0 = smov 15  }
  0x19   :  { %v250_v25 = vshrl.u32 %v2108_v17, 16  ;;  %v83_v27 = vrot.slane %v78_v18, %v2428_v2  ;;  %v90_v28 = vrot.slane %v85_v19, %v2428_v2  ;;  %v193_v31 = vrot.slane %v188_v22, %v2430_v3  ;;  %v1204_v16 = vld [vmem:[%s3040_s1] sm:$0x22]  ;;  %s2376_s19 = smov 16   ;;  %s2377_s20 = smov 17  }
  0x1a   :  { %v133_v29 = vpack.i.b16 %v132_v20, %v132_v20  ;;  %v141_v30 = vpack.i.b16 %v140_v21, %v140_v21  ;;  %v200_v32 = vrot.slane %v195_v23, %v2430_v3  ;;  %v243_v33 = vpack.i.b16 %v242_v24, %v242_v24 }
  0x1b   :  { %v251_v34 = vpack.i.b16 %v250_v25, %v250_v25  ;;  %v2094_v36 = vcombine.low %v83_v27, %v90_v28  ;;  %v2117_v39 = vcombine.low %v333_v26, %v333_v26  ;;  %v2118_v44 = vcombine.high %v333_v26, %v333_v26  ;;  %v1255_v25 = vld [vmem:[%s3040_s1] sm:$0x22] }
  0x1c   :  { %v138_v37 = vrot.slane %v133_v29, %v2428_v2  ;;  %v146_v38 = vrot.slane %v141_v30, %v2428_v2  ;;  %v2104_v41 = vcombine.low %v193_v31, %v200_v32  ;;  %v248_v42 = vrot.slane %v243_v33, %v2430_v3  ;;  %v1350_v29 = vld [vmem:[%s3040_s1] sm:$0x44] }
  0x1d   :  { %v256_v43 = vrot.slane %v251_v34, %v2430_v3  ;;  %96 = vrot.lane.b32.xlu0 %v2094_v36, %s2370_s26  ;;  %v340_v47 = vshrl.u32 %v2117_v39, 16  ;;  %v2122_v48 = vcombine.low %v387_v35, %v387_v35  ;;  %v2123_v49 = vcombine.high %v387_v35, %v387_v35 }
  0x1e   :  { %v2099_v46 = vcombine.low %v138_v37, %v146_v38  ;;  %206 = vrot.lane.b32.xlu1 %v2104_v41, %s2371_s27  ;;  %v348_v51 = vshrl.u32 %v2118_v44, 16  ;;  %v2127_v52 = vcombine.low %v439_v40, %v439_v40  ;;  %v2128_v53 = vcombine.high %v439_v40, %v439_v40 }
  0x1f   :  { %v2109_v50 = vcombine.low %v248_v42, %v256_v43  ;;  %v341_v54 = vpack.i.b16 %v340_v47, %v340_v47  ;;  %v394_v55 = vpack.i.b16 %v2122_v48, %v2122_v48  ;;  %v401_v56 = vpack.i.b16 %v2123_v49, %v2123_v49  ;;  %v1403_v42 = vld [vmem:[%s3040_s1] sm:$0x88] }
  0x20   :  { %v2132_v57 = vcombine.low %v493_v45, %v493_v45  ;;  %v349_v58 = vpack.i.b16 %v348_v51, %v348_v51  ;;  %v446_v59 = vshrl.u32 %v2127_v52, 16  ;;  %v454_v60 = vshrl.u32 %v2128_v53, 16 }
  0x21   :  { %v2133_v61 = vcombine.high %v493_v45, %v493_v45  ;;  %152 = vrot.lane.b32.xlu0 %v2099_v46, %s2372_s30  ;;  %v346_v63 = vrot.slane %v341_v54, %v2432_v4  ;;  %v399_v0 = vrot.slane %v394_v55, %v2434_v5  ;;  %v406_v1 = vrot.slane %v401_v56, %v2434_v5  ;;  %v1454_v55 = vld [vmem:[%s3040_s1] sm:$0x88] }
  0x22   :  { %v500_v6 = vpack.i.b16 %v2132_v57, %v2132_v57  ;;  %262 = vrot.lane.b32.xlu1 %v2109_v50, %s2373_s7  ;;  %v354_v7 = vrot.slane %v349_v58, %v2432_v4  ;;  %v447_v8 = vpack.i.b16 %v446_v59, %v446_v59  ;;  %v455_v9 = vpack.i.b16 %v454_v60, %v454_v60  ;;  %v1507_v60 = vld [vmem:[%s3040_s1 + $0x8] sm:$0x11] }
  0x23   :  { %v507_v10 = vpack.i.b16 %v2133_v61, %v2133_v61  ;;  %v2124_v12 = vcombine.low %v399_v0, %v406_v1  ;;  %v2161_v14 = vcombine.low %v1100_v62, %v1100_v62  ;;  %v2162_v15 = vcombine.high %v1100_v62, %v1100_v62 }
  0x24   :  { %v505_v13 = vrot.slane %v500_v6, %v2428_v2  ;;  %v2119_v17 = vcombine.low %v346_v63, %v354_v7  ;;  %v452_v18 = vrot.slane %v447_v8, %v2434_v5  ;;  %v460_v19 = vrot.slane %v455_v9, %v2434_v5 }
  0x25   :  { %v512_v20 = vrot.slane %v507_v10, %v2428_v2  ;;  %v1107_v21 = vpack.i.b16 %v2161_v14, %v2161_v14  ;;  %v1114_v22 = vpack.i.b16 %v2162_v15, %v2162_v15  ;;  %v2166_v23 = vcombine.low %v1151_v11, %v1151_v11 }
  0x26   :  { %v2167_v24 = vcombine.high %v1151_v11, %v1151_v11  ;;  %360 = vrot.lane.b32.xlu0 %v2119_v17, %s2374_s14  ;;  %412 = vrot.lane.b32.xlu1 %v2124_v12, %s2375_s0  ;;  %v2129_v26 = vcombine.low %v452_v18, %v460_v19  ;;  %v2171_v28 = vcombine.low %v1204_v16, %v1204_v16  ;;  %vm48_vm0 = vcmask 7168  }
  0x27   :  { %v2134_v27 = vcombine.low %v505_v13, %v512_v20  ;;  %v1112_v30 = vrot.slane %v1107_v21, %v2428_v2  ;;  %v1119_v31 = vrot.slane %v1114_v22, %v2428_v2  ;;  %v1158_v32 = vshrl.u32 %v2166_v23, 16 }
  0x28   :  { %v1166_v33 = vshrl.u32 %v2167_v24, 16  ;;  %v2172_v34 = vcombine.high %v1204_v16, %v1204_v16  ;;  %v1211_v35 = vpack.i.b16 %v2171_v28, %v2171_v28  ;;  %v2176_v36 = vcombine.low %v1255_v25, %v1255_v25 }
  0x29   :  { %v2177_v37 = vcombine.high %v1255_v25, %v1255_v25  ;;  %v2163_v38 = vcombine.low %v1112_v30, %v1119_v31  ;;  %v1159_v39 = vpack.i.b16 %v1158_v32, %v1158_v32  ;;  %v2186_v41 = vcombine.low %v1350_v29, %v1350_v29  ;;  %v2550_v32 = vld [vmem:[#allocation5] sm:$0xff] }
  0x2a   :  { %v1167_v40 = vpack.i.b16 %v1166_v33, %v1166_v33  ;;  %466 = vrot.lane.b32.xlu0 %v2129_v26, %s2376_s19  ;;  %518 = vrot.lane.b32.xlu1 %v2134_v27, %s2377_s20  ;;  %v1216_v43 = vrot.slane %v1211_v35, %v2430_v3  ;;  %v1218_v44 = vpack.i.b16 %v2172_v34, %v2172_v34  ;;  %v1262_v45 = vshrl.u32 %v2176_v36, 16  ;;  %v2552_v33 = vld [vmem:[#allocation5 + $0x8] sm:$0xff] }
  0x2b   :  { %v1270_v46 = vshrl.u32 %v2177_v37, 16  ;;  %v1164_v47 = vrot.slane %v1159_v39, %v2428_v2  ;;  %v2187_v49 = vcombine.high %v1350_v29, %v1350_v29  ;;  %v1357_v50 = vshrl.u32 %v2186_v41, 16 }
  0x2c   :  { %v1172_v48 = vrot.slane %v1167_v40, %v2428_v2  ;;  %v1223_v51 = vrot.slane %v1218_v44, %v2430_v3  ;;  %v1263_v52 = vpack.i.b16 %v1262_v45, %v1262_v45  ;;  %v2191_v54 = vcombine.low %v1403_v42, %v1403_v42 }
  0x2d   :  { %v1271_v53 = vpack.i.b16 %v1270_v46, %v1270_v46  ;;  %v1358_v57 = vpack.i.b16 %v1357_v50, %v1357_v50  ;;  %v1365_v58 = vshrl.u32 %v2187_v49, 16  ;;  %v2192_v59 = vcombine.high %v1403_v42, %v1403_v42  ;;  %v291_v46 = vld [vmem:[%s3040_s1] sm:$0x44] }
  0x2e   :  { %v2168_v56 = vcombine.low %v1164_v47, %v1172_v48  ;;  %1125 = vrot.lane.b32.xlu0 %v2163_v38, %s2370_s26  ;;  %v2173_v61 = vcombine.low %v1216_v43, %v1223_v51  ;;  %v1268_v62 = vrot.slane %v1263_v52, %v2430_v3  ;;  %v1410_v0 = vpack.i.b16 %v2191_v54, %v2191_v54 }
  0x2f   :  { %v1276_v63 = vrot.slane %v1271_v53, %v2430_v3  ;;  %v1363_v1 = vrot.slane %v1358_v57, %v2432_v4  ;;  %v1366_v6 = vpack.i.b16 %v1365_v58, %v1365_v58  ;;  %v1417_v7 = vpack.i.b16 %v2192_v59, %v2192_v59 }
  0x30   :  { %1178 = vrot.lane.b32.xlu1 %v2168_v56, %s2372_s30  ;;  %v2196_v8 = vcombine.low %v1454_v55, %v1454_v55  ;;  %v1415_v10 = vrot.slane %v1410_v0, %v2434_v5  ;;  %v2197_v11 = vcombine.high %v1454_v55, %v1454_v55  ;;  %v2201_v12 = vcombine.low %v1507_v60, %v1507_v60 }
  0x31   :  { %v2178_v9 = vcombine.low %v1268_v62, %v1276_v63  ;;  %v1371_v13 = vrot.slane %v1366_v6, %v2432_v4  ;;  %v1422_v14 = vrot.slane %v1417_v7, %v2434_v5  ;;  %v2202_v16 = vcombine.high %v1507_v60, %v1507_v60 }
  0x32   :  { %v1461_v15 = vshrl.u32 %v2196_v8, 16  ;;  %1229 = vrot.lane.b32.xlu0 %v2173_v61, %s2371_s27  ;;  %v1469_v17 = vshrl.u32 %v2197_v11, 16  ;;  %v1514_v18 = vpack.i.b16 %v2201_v12, %v2201_v12  ;;  %vm45_vm1 = vcmask 121856  }
  0x33   :  { %v2188_v19 = vcombine.low %v1363_v1, %v1371_v13  ;;  %v2193_v20 = vcombine.low %v1415_v10, %v1422_v14  ;;  %v1521_v22 = vpack.i.b16 %v2202_v16, %v2202_v16  ;;  %vm42_vm2 = vcmask 130048  }
  0x34   :  { %1282 = vrot.lane.b32.xlu1 %v2178_v9, %s2373_s7  ;;  %v1462_v21 = vpack.i.b16 %v1461_v15, %v1461_v15  ;;  %v1470_v23 = vpack.i.b16 %v1469_v17, %v1469_v17  ;;  %v1519_v24 = vrot.slane %v1514_v18, %v2428_v2  ;;  %vm39_vm3 = vcmask 138240  }
  0x35   :  { %v1526_v26 = vrot.slane %v1521_v22, %v2428_v2  ;;  %v2378_v30 = vmov 0   ;;  %vm99_vm4 = vcmask 908288   ;;  %vm209_vm5 = vcmask 924672  }
  0x36   :  { %v1467_v25 = vrot.slane %v1462_v21, %v2434_v5  ;;  %1377 = vrot.lane.b32.xlu0 %v2188_v19, %s2374_s14  ;;  %v1475_v27 = vrot.slane %v1470_v23, %v2434_v5  ;;  %40 = vst.msk [vmem:[#allocation2] sm:$0xff] %vm39_vm3, %v2378_v30  ;;  %41 = vst.msk [vmem:[#allocation3] sm:$0xff] %vm39_vm3, %v2378_v30  ;;  %2241 = vset.pattern.permute.xlu1 %v2378_v30  ;;  %vm155_vm6 = vcmask 916480   ;;  %vm51_vm7 = vcmask 1048568  }
  0x37   :  { %v2203_v28 = vcombine.low %v1519_v24, %v1526_v26  ;;  %43 = vst.msk [vmem:[#allocation2 + $0x10] sm:$0xff] %vm42_vm2, %v2378_v30  ;;  %44 = vst.msk [vmem:[#allocation3 + $0x10] sm:$0xff] %vm42_vm2, %v2378_v30  ;;  %2240 = vset.pattern.permute.xlu0 %v2378_v30  ;;  %vm265_vm8 = vcmask 1039360   ;;  %v2112_v55 = vcombine.low %v291_v46, %v291_v46  ;;  %v2113_v56 = vcombine.high %v291_v46, %v291_v46 }
  0x38   :  { %1428 = vrot.lane.b32.xlu1 %v2193_v20, %s2375_s0  ;;  %v2198_v29 = vcombine.low %v1467_v25, %v1475_v27  ;;  %46 = vst.msk [vmem:[#allocation2 + $0x20] sm:$0xff] %vm45_vm1, %v2378_v30  ;;  %47 = vst.msk [vmem:[#allocation3 + $0x20] sm:$0xff] %vm45_vm1, %v2378_v30  ;;  %vm54_vm9 = vcmask 1048456   ;;  %vm57_vm10 = vcmask 1048448   ;;  %v1308_v25 = vld [vmem:[%s3040_s1] sm:$0x44] }
  0x39   :  { %49 = vst.msk [vmem:[#allocation2 + $0x30] sm:$0xff] %vm48_vm0, %v2378_v30  ;;  %50 = vst.msk [vmem:[#allocation3 + $0x30] sm:$0xff] %vm48_vm0, %v2378_v30  ;;  %v298_v62 = vpack.i.b16 %v2112_v55, %v2112_v55  ;;  %v305_v63 = vpack.i.b16 %v2113_v56, %v2113_v56  ;;  %vm60_vm11 = vcmask 1048440   ;;  %vm120_vm12 = vcmask 1047688  }
  0x3a   :  { %1481 = vrot.lane.b32.xlu0 %v2198_v29, %s2376_s19  ;;  %52 = vst.msk [vmem:[#allocation2 + $0x58] sm:$0xff] %vm51_vm7, %v2378_v30  ;;  %53 = vst.msk [vmem:[#allocation3 + $0x58] sm:$0xff] %vm51_vm7, %v2378_v30  ;;  %vm176_vm13 = vcmask 1047680   ;;  %vm230_vm14 = vcmask 1047672   ;;  %vm286_vm15 = vcmask 1047560  }
  0x3b   :  { %55 = vst.msk [vmem:[#allocation2 + $0x68] sm:$0xff] %vm54_vm9, %v2378_v30  ;;  %56 = vst.msk [vmem:[#allocation3 + $0x68] sm:$0xff] %vm54_vm9, %v2378_v30  ;;  %v303_v10 = vrot.slane %v298_v62, %v2432_v4  ;;  %v310_v11 = vrot.slane %v305_v63, %v2432_v4 }
  0x3c   :  { %1532 = vrot.lane.b32.xlu1 %v2203_v28, %s2377_s20  ;;  %58 = vst.msk [vmem:[#allocation2 + $0x78] sm:$0xff] %vm57_vm10, %v2378_v30  ;;  %59 = vst.msk [vmem:[#allocation3 + $0x78] sm:$0xff] %vm57_vm10, %v2378_v30 }
  0x3d   :  { %v2114_v16 = vcombine.low %v303_v10, %v310_v11  ;;  %61 = vst.msk [vmem:[#allocation2 + $0x88] sm:$0xff] %vm60_vm11, %v2378_v30  ;;  %62 = vst.msk [vmem:[#allocation3 + $0x88] sm:$0xff] %vm60_vm11, %v2378_v30 }
  0x3f   :  { %v2588_v20 = vmul.bf16 %v2114_v16, %v2550_v32  ;;  %v2591_v21 = vmul.bf16 %v2114_v16, %v2552_v33 }
  0x41   :  { %v2116_v28 = vcombine.high %v2588_v20, %v2591_v21 }
  0x8f   :  { %v97_v31 = vpop.permute.xlu0 %96 }
  0x90   :  { %v98_v34 = vrot.slane %v97_v31, 4  ;;  %v207_v35 = vpop.permute.xlu1 %206 }
  0x91   :  { %v208_v36 = vrot.slane %v207_v35, 4 }
  0x92   :  { %v100_v37 = vsel %vm99_vm4, %v97_v31, %v98_v34  ;;  %v2181_v31 = vcombine.low %v1308_v25, %v1308_v25 }
  0x93   :  { %v102_v38 = vmul.bf16 %v100_v37, %v2550_v32  ;;  %v103_v39 = vmul.bf16 %v100_v37, %v2552_v33  ;;  %v153_v40 = vpop.permute.xlu0 %152  ;;  %v210_v43 = vsel %vm209_vm5, %v207_v35, %v208_v36  ;;  %v2182_v35 = vcombine.high %v1308_v25, %v1308_v25 }
  0x94   :  { %v154_v41 = vrot.slane %v153_v40, 4  ;;  %v263_v42 = vpop.permute.xlu1 %262  ;;  %v212_v51 = vmul.bf16 %v210_v43, %v2550_v32  ;;  %v213_v52 = vmul.bf16 %v210_v43, %v2552_v33 }
  0x95   :  { %v2096_v44 = vcombine.high %v102_v38, %v103_v39  ;;  %v2095_v45 = vcombine.low %v102_v38, %v103_v39  ;;  %v264_v48 = vrot.slane %v263_v42, 4  ;;  %v1315_v38 = vpack.i.b16 %v2181_v31, %v2181_v31 }
  0x96   :  { %v156_v47 = vsel %vm155_vm6, %v153_v40, %v154_v41  ;;  %v2106_v0 = vcombine.high %v212_v51, %v213_v52  ;;  %v2105_v1 = vcombine.low %v212_v51, %v213_v52  ;;  %v2617_v51 = vld [vmem:[#allocation5 + $0x10] sm:$0xff]  ;;  %v2619_v52 = vld [vmem:[#allocation5 + $0x18] sm:$0xff] }
  0x97   :  { %v158_v49 = vmul.bf16 %v156_v47, %v2550_v32  ;;  %v159_v50 = vmul.bf16 %v156_v47, %v2552_v33  ;;  %114 = vrot.lane.b32.xlu1 %v2096_v44, %s2377_s20  ;;  %112 = vrot.lane.b32.xlu0 %v2095_v45, %s2377_s20  ;;  %v266_v60 = vsel %vm265_vm8, %v263_v42, %v264_v48 }
  0x98   :  { %v361_v53 = vpop.permute.xlu0 %360  ;;  %v413_v54 = vpop.permute.xlu1 %412  ;;  %v268_v7 = vmul.bf16 %v266_v60, %v2550_v32  ;;  %v269_v8 = vmul.bf16 %v266_v60, %v2552_v33  ;;  %v1322_v44 = vpack.i.b16 %v2182_v35, %v2182_v35  ;;  %v1320_v46 = vrot.slane %v1315_v38, %v2432_v4 }
  0x99   :  { %v2100_v57 = vcombine.low %v158_v49, %v159_v50  ;;  %v2101_v58 = vcombine.high %v158_v49, %v159_v50  ;;  %v362_v59 = vrot.slane %v361_v53, 4  ;;  %v414_v61 = vrot.slane %v413_v54, 4 }
  0x9a   :  { %v2111_v18 = vcombine.high %v268_v7, %v269_v8  ;;  %v2110_v19 = vcombine.low %v268_v7, %v269_v8  ;;  %v2115_v47 = vcombine.low %v2588_v20, %v2591_v21 }
  0x9b   :  { %168 = vrot.lane.b32.xlu1 %v2100_v57, %s2376_s19  ;;  %170 = vrot.lane.b32.xlu0 %v2101_v58, %s2376_s19  ;;  %v363_v6 = vsel %vm48_vm0, %v362_v59, %v361_v53  ;;  %v415_v12 = vsel %vm45_vm1, %v414_v61, %v413_v54 }
  0x9c   :  { %v467_v9 = vpop.permute.xlu0 %466  ;;  %v365_v13 = vmul.bf16 %v363_v6, %v2550_v32  ;;  %v366_v14 = vmul.bf16 %v363_v6, %v2552_v33  ;;  %v519_v15 = vpop.permute.xlu1 %518  ;;  %v417_v22 = vmul.bf16 %v415_v12, %v2550_v32  ;;  %v418_v23 = vmul.bf16 %v415_v12, %v2552_v33  ;;  %v2639_v6 = vld [vmem:[%s3041_s2 + $0x4] ss:$8 sps:$4 sm:$0xff]  }
  0x9d   :  { %v468_v17 = vrot.slane %v467_v9, 4  ;;  %v520_v24 = vrot.slane %v519_v15, 4  ;;  %2139 = vmatprep.mubr.msk.bf16.mxu0 %vm42_vm2, %v2639_v6 }
  0x9e   :  { %v2121_v26 = vcombine.high %v365_v13, %v366_v14  ;;  %v2120_v27 = vcombine.low %v365_v13, %v366_v14  ;;  %v2126_v36 = vcombine.high %v417_v22, %v418_v23  ;;  %v2125_v37 = vcombine.low %v417_v22, %v418_v23 }
  0x9f   :  { %224 = vrot.lane.b32.xlu1 %v2106_v0, %s2375_s0  ;;  %222 = vrot.lane.b32.xlu0 %v2105_v1, %s2375_s0  ;;  %v469_v29 = vsel %vm42_vm2, %v468_v17, %v467_v9  ;;  %v521_v41 = vsel %vm39_vm3, %v520_v24, %v519_v15 }
  0xa0   :  { %v1126_v34 = vpop.permute.xlu0 %1125  ;;  %v471_v39 = vmul.bf16 %v469_v29, %v2550_v32  ;;  %v472_v40 = vmul.bf16 %v469_v29, %v2552_v33  ;;  %v523_v30 = vmul.bf16 %v521_v41, %v2550_v32  ;;  %v524_v45 = vmul.bf16 %v521_v41, %v2552_v33 }
  0xa1   :  { %v1127_v42 = vrot.slane %v1126_v34, 4  ;;  %v1327_v33 = vrot.slane %v1322_v44, %v2432_v4 }
  0xa2   :  { %v1179_v43 = vpop.permute.xlu1 %1178  ;;  %v2131_v48 = vcombine.high %v471_v39, %v472_v40  ;;  %v2130_v49 = vcombine.low %v471_v39, %v472_v40  ;;  %v2136_v54 = vcombine.high %v523_v30, %v524_v45  ;;  %v2135_v55 = vcombine.low %v523_v30, %v524_v45 }
  0xa3   :  { %280 = vrot.lane.b32.xlu1 %v2111_v18, %s2374_s14  ;;  %278 = vrot.lane.b32.xlu0 %v2110_v19, %s2374_s14  ;;  %v1180_v50 = vrot.slane %v1179_v43, 4  ;;  %v1128_v32 = vsel %vm99_vm4, %v1126_v34, %v1127_v42  ;;  %v2183_v56 = vcombine.low %v1320_v46, %v1327_v33 }
  0xa4   :  { %v1230_v53 = vpop.permute.xlu0 %1229  ;;  %v1130_v57 = vmul.bf16 %v1128_v32, %v2617_v51  ;;  %v1131_v58 = vmul.bf16 %v1128_v32, %v2619_v52 }
  0xa5   :  { %v1181_v59 = vsel %vm155_vm6, %v1179_v43, %v1180_v50  ;;  %v1231_v60 = vrot.slane %v1230_v53, 4  ;;  %v2629_v62 = vmul.bf16 %v2183_v56, %v2617_v51  ;;  %v2632_v63 = vmul.bf16 %v2183_v56, %v2619_v52 }
  0xa6   :  { %v1283_v61 = vpop.permute.xlu1 %1282  ;;  %v1183_v0 = vmul.bf16 %v1181_v59, %v2617_v51  ;;  %v1184_v1 = vmul.bf16 %v1181_v59, %v2619_v52  ;;  %v2165_v7 = vcombine.high %v1130_v57, %v1131_v58  ;;  %v2164_v8 = vcombine.low %v1130_v57, %v1131_v58  ;;  %v636_v58 = vld [vmem:[%s3040_s1] sm:$0x11] }
  0xa7   :  { %377 = vrot.lane.b32.xlu1 %v2121_v26, %s2373_s7  ;;  %375 = vrot.lane.b32.xlu0 %v2120_v27, %s2373_s7  ;;  %v1284_v9 = vrot.slane %v1283_v61, 4  ;;  %v2185_v10 = vcombine.high %v2629_v62, %v2632_v63  ;;  %v1232_v11 = vsel %vm209_vm5, %v1230_v53, %v1231_v60  ;;  %v2184_v12 = vcombine.low %v2629_v62, %v2632_v63 }
  0xa8   :  { %v1378_v13 = vpop.permute.xlu0 %1377  ;;  %v2170_v14 = vcombine.high %v1183_v0, %v1184_v1  ;;  %v2169_v15 = vcombine.low %v1183_v0, %v1184_v1  ;;  %v1234_v16 = vmul.bf16 %v1232_v11, %v2617_v51  ;;  %v1235_v17 = vmul.bf16 %v1232_v11, %v2619_v52  ;;  %v726_v0 = vld [vmem:[%s3040_s1] sm:$0x22] }
  0xa9   :  { %v1285_v18 = vsel %vm265_vm8, %v1283_v61, %v1284_v9  ;;  %v1379_v19 = vrot.slane %v1378_v13, 4  ;;  %v2140_v59 = vcombine.low %v636_v58, %v636_v58  ;;  %v2141_v60 = vcombine.high %v636_v58, %v636_v58  ;;  %v680_v61 = vld [vmem:[%s3040_s1] sm:$0x11]  ;;  %v770_v1 = vld [vmem:[%s3040_s1] sm:$0x22] }
  0xaa   :  { %v1429_v22 = vpop.permute.xlu1 %1428  ;;  %v1287_v23 = vmul.bf16 %v1285_v18, %v2617_v51  ;;  %v1288_v24 = vmul.bf16 %v1285_v18, %v2619_v52  ;;  %v2175_v25 = vcombine.high %v1234_v16, %v1235_v17  ;;  %v2174_v26 = vcombine.low %v1234_v16, %v1235_v17 }
  0xab   :  { %429 = vrot.lane.b32.xlu1 %v2126_v36, %s2371_s27  ;;  %427 = vrot.lane.b32.xlu0 %v2125_v37, %s2371_s27  ;;  %v1430_v27 = vrot.slane %v1429_v22, 4  ;;  %v1380_v29 = vsel %vm48_vm0, %v1379_v19, %v1378_v13  ;;  %v2144_v9 = vcombine.low %v726_v0, %v726_v0  ;;  %v2145_v11 = vcombine.high %v726_v0, %v726_v0  ;;  %v842_v19 = vld [vmem:[%s3040_s1] sm:$0x44] }
  0xac   :  { %v1482_v31 = vpop.permute.xlu0 %1481  ;;  %v2180_v34 = vcombine.high %v1287_v23, %v1288_v24  ;;  %v2179_v35 = vcombine.low %v1287_v23, %v1288_v24  ;;  %v1382_v36 = vmul.bf16 %v1380_v29, %v2617_v51  ;;  %v1383_v37 = vmul.bf16 %v1380_v29, %v2619_v52 }
  0xad   :  { %v1431_v38 = vsel %vm45_vm1, %v1430_v27, %v1429_v22  ;;  %v1483_v39 = vrot.slane %v1482_v31, 4  ;;  %v643_v13 = vpack.i.b16 %v2140_v59, %v2140_v59  ;;  %v2147_v16 = vcombine.high %v770_v1, %v770_v1 }
  0xae   :  { %v1533_v40 = vpop.permute.xlu1 %1532  ;;  %v1433_v41 = vmul.bf16 %v1431_v38, %v2617_v51  ;;  %v1434_v42 = vmul.bf16 %v1431_v38, %v2619_v52  ;;  %v2190_v43 = vcombine.high %v1382_v36, %v1383_v37  ;;  %v2189_v44 = vcombine.low %v1382_v36, %v1383_v37 }
  0xaf   :  { %483 = vrot.lane.b32.xlu1 %v2131_v48, %s2372_s30  ;;  %481 = vrot.lane.b32.xlu0 %v2130_v49, %s2372_s30  ;;  %v1534_v30 = vrot.slane %v1533_v40, 4  ;;  %v1484_v45 = vsel %vm42_vm2, %v1483_v39, %v1482_v31  ;;  %v648_v22 = vrot.slane %v643_v13, %v2428_v2  ;;  %v785_v27 = vshrl.u32 %v2147_v16, 16 }
  0xb0   :  { %v2195_v46 = vcombine.high %v1433_v41, %v1434_v42  ;;  %v2194_v48 = vcombine.low %v1433_v41, %v1434_v42  ;;  %v1486_v49 = vmul.bf16 %v1484_v45, %v2617_v51  ;;  %v1487_v50 = vmul.bf16 %v1484_v45, %v2619_v52 }
  0xb1   :  { %v1535_v32 = vsel %vm39_vm3, %v1534_v30, %v1533_v40  ;;  %v733_v29 = vpack.i.b16 %v2144_v9, %v2144_v9  ;;  %v740_v31 = vpack.i.b16 %v2145_v11, %v2145_v11  ;;  %v2151_v37 = vcombine.high %v842_v19, %v842_v19  ;;  %v888_v40 = vld [vmem:[%s3040_s1] sm:$0x88]  ;;  %v1671_v9 = vld [vmem:[%s3040_s1] sm:$0x11] }
  0xb2   :  { %v1537_v33 = vmul.bf16 %v1535_v32, %v2617_v51  ;;  %v1538_v53 = vmul.bf16 %v1535_v32, %v2619_v52  ;;  %v66_v51 = vld [vmem:[%s3042_s3 + $0x8] sm:$0xff]  ;;  %v65_v52 = vld [vmem:[%s3042_s3] sm:$0xff]  ;;  %v786_v39 = vpack.i.b16 %v785_v27, %v785_v27  ;;  %v2152_v45 = vcombine.low %v888_v40, %v888_v40 }
  0xb3   :  { %535 = vrot.lane.b32.xlu1 %v2136_v54, %s2370_s26  ;;  %533 = vrot.lane.b32.xlu0 %v2135_v55, %s2370_s26  ;;  %v2200_v54 = vcombine.high %v1486_v49, %v1487_v50  ;;  %v2199_v55 = vcombine.low %v1486_v49, %v1487_v50  ;;  %v738_v41 = vrot.slane %v733_v29, %v2430_v3  ;;  %v932_v30 = vld [vmem:[%s3040_s1] sm:$0x88] }
  0xb4   :  { %v2205_v56 = vcombine.high %v1537_v33, %v1538_v53  ;;  %v2204_v57 = vcombine.low %v1537_v33, %v1538_v53  ;;  %v745_v42 = vrot.slane %v740_v31, %v2430_v3  ;;  %v2153_v49 = vcombine.high %v888_v40, %v888_v40  ;;  %v1761_v31 = vld [vmem:[%s3040_s1] sm:$0x22] }
  0xb5   :  { %v2154_v50 = vcombine.low %v932_v30, %v932_v30  ;;  %v2155_v53 = vcombine.high %v932_v30, %v932_v30 }
  0xb7   :  { %1142 = vrot.lane.b32.xlu1 %v2165_v7, %s2377_s20  ;;  %1140 = vrot.lane.b32.xlu0 %v2164_v8, %s2377_s20  ;;  %v2142_v7 = vcombine.low %v680_v61, %v680_v61  ;;  %v2143_v8 = vcombine.high %v680_v61, %v680_v61  ;;  %v947_v58 = vshrl.u32 %v2155_v53, 16  ;;  %v1879_v53 = vld [vmem:[%s3040_s1] sm:$0x88] }
  0xb9   :  { %v687_v17 = vshrl.u32 %v2142_v7, 16  ;;  %v695_v18 = vshrl.u32 %v2143_v8, 16  ;;  %v948_v7 = vpack.i.b16 %v947_v58, %v947_v58  ;;  %v1627_v8 = vld [vmem:[%s3040_s1] sm:$0x11] }
  0xba   :  { %v2208_v16 = vcombine.high %v1627_v8, %v1627_v8 }
  0xbb   :  { %1195 = vrot.lane.b32.xlu1 %v2170_v14, %s2376_s19  ;;  %1193 = vrot.lane.b32.xlu0 %v2169_v15, %s2376_s19  ;;  %v650_v14 = vpack.i.b16 %v2141_v60, %v2141_v60  ;;  %v2146_v15 = vcombine.low %v770_v1, %v770_v1  ;;  %v688_v24 = vpack.i.b16 %v687_v17, %v687_v17 }
  0xbc   :  { %v953_v17 = vrot.slane %v948_v7, %v2434_v5 }
  0xbd   :  { %v655_v23 = vrot.slane %v650_v14, %v2428_v2 }
  0xbf   :  { %1246 = vrot.lane.b32.xlu1 %v2175_v25, %s2375_s0  ;;  %1244 = vrot.lane.b32.xlu0 %v2174_v26, %s2375_s0  ;;  %v696_v25 = vpack.i.b16 %v695_v18, %v695_v18  ;;  %v777_v26 = vshrl.u32 %v2146_v15, 16  ;;  %v2207_v15 = vcombine.low %v1627_v8, %v1627_v8  ;;  %v2209_v18 = vcombine.low %v1671_v9, %v1671_v9 }
  0xc1   :  { %v701_v36 = vrot.slane %v696_v25, %v2428_v2  ;;  %v778_v38 = vpack.i.b16 %v777_v26, %v777_v26  ;;  %v1678_v27 = vshrl.u32 %v2209_v18, 16  ;;  %v1969_v18 = vld [vmem:[%s3040_s1 + $0x8] sm:$0x11] }
  0xc3   :  { %1299 = vrot.lane.b32.xlu1 %v2180_v34, %s2374_s14  ;;  %1297 = vrot.lane.b32.xlu0 %v2179_v35, %s2374_s14  ;;  %v2150_v34 = vcombine.low %v842_v19, %v842_v19  ;;  %v693_v35 = vrot.slane %v688_v24, %v2428_v2  ;;  %v2210_v19 = vcombine.high %v1671_v9, %v1671_v9  ;;  %v1717_v24 = vld [vmem:[%s3040_s1] sm:$0x22] }
  0xc5   :  { %v1686_v29 = vshrl.u32 %v2210_v19, 16 }
  0xc7   :  { %1394 = vrot.lane.b32.xlu1 %v2190_v43, %s2373_s7  ;;  %1392 = vrot.lane.b32.xlu0 %v2189_v44, %s2373_s7  ;;  %v849_v43 = vshrl.u32 %v2150_v34, 16  ;;  %v857_v44 = vshrl.u32 %v2151_v37, 16  ;;  %v2211_v34 = vcombine.low %v1717_v24, %v1717_v24  ;;  %v2212_v37 = vcombine.high %v1717_v24, %v1717_v24 }
  0xc8   :  { %v1687_v40 = vpack.i.b16 %v1686_v29, %v1686_v29  ;;  %v2223_v24 = vcombine.low %v1969_v18, %v1969_v18 }
  0xc9   :  { %v850_v32 = vpack.i.b16 %v849_v43, %v849_v43  ;;  %v858_v33 = vpack.i.b16 %v857_v44, %v857_v44  ;;  %v1724_v43 = vpack.i.b16 %v2211_v34, %v2211_v34  ;;  %v1731_v44 = vpack.i.b16 %v2212_v37, %v2212_v37 }
  0xca   :  { %v1976_v37 = vpack.i.b16 %v2223_v24, %v2223_v24 }
  0xcb   :  { %1445 = vrot.lane.b32.xlu1 %v2195_v46, %s2371_s27  ;;  %1443 = vrot.lane.b32.xlu0 %v2194_v48, %s2371_s27  ;;  %v783_v46 = vrot.slane %v778_v38, %v2430_v3  ;;  %v791_v48 = vrot.slane %v786_v39, %v2430_v3  ;;  %v2213_v38 = vcombine.low %v1761_v31, %v1761_v31 }
  0xcc   :  { %v1679_v39 = vpack.i.b16 %v1678_v27, %v1678_v27 }
  0xcd   :  { %v1768_v30 = vshrl.u32 %v2213_v38, 16 }
  0xcf   :  { %1498 = vrot.lane.b32.xlu1 %v2200_v54, %s2372_s30  ;;  %1496 = vrot.lane.b32.xlu0 %v2199_v55, %s2372_s30  ;;  %v895_v54 = vpack.i.b16 %v2152_v45, %v2152_v45  ;;  %v939_v55 = vshrl.u32 %v2154_v50, 16 }
  0xd1   :  { %v940_v60 = vpack.i.b16 %v939_v55, %v939_v55  ;;  %v900_v0 = vrot.slane %v895_v54, %v2434_v5  ;;  %v1729_v54 = vrot.slane %v1724_v43, %v2430_v3  ;;  %v1736_v55 = vrot.slane %v1731_v44, %v2430_v3 }
  0xd3   :  { %1549 = vrot.lane.b32.xlu1 %v2205_v56, %s2370_s26  ;;  %1547 = vrot.lane.b32.xlu0 %v2204_v57, %s2370_s26  ;;  %v978_v56 = vld [vmem:[%s3040_s1 + $0x8] sm:$0x11]  ;;  %v855_v57 = vrot.slane %v850_v32, %v2432_v4  ;;  %v945_v13 = vrot.slane %v940_v60, %v2434_v5  ;;  %v1769_v32 = vpack.i.b16 %v1768_v30, %v1768_v30 }
  0xd4   :  { %v2156_v59 = vcombine.low %v978_v56, %v978_v56  ;;  %v2157_v61 = vcombine.high %v978_v56, %v978_v56  ;;  %v2220_v60 = vcombine.high %v1879_v53, %v1879_v53  ;;  %v1981_v30 = vrot.slane %v1976_v37, %v2428_v2 }
  0xd5   :  { %v1774_v58 = vrot.slane %v1769_v32, %v2430_v3 }
  0xd6   :  { %v985_v11 = vpack.i.b16 %v2156_v59, %v2156_v59  ;;  %v992_v14 = vpack.i.b16 %v2157_v61, %v2157_v61 }
  0xd7   :  { %568 = vperm.xlu1 %2241, %v66_v51   ;;  %563 = vperm.xlu0 %2240, %v65_v52   ;;  %v863_v51 = vrot.slane %v858_v33, %v2432_v4  ;;  %v902_v52 = vpack.i.b16 %v2153_v49, %v2153_v49 }
  0xd8   :  { %v990_v25 = vrot.slane %v985_v11, %v2428_v2  ;;  %v997_v26 = vrot.slane %v992_v14, %v2428_v2 }
  0xd9   :  { %v907_v1 = vrot.slane %v902_v52, %v2434_v5  ;;  %v2219_v52 = vcombine.low %v1879_v53, %v1879_v53 }
  0xdb   :  { %658 = vrot.lane.b32.xlu1 %v648_v22, %s2370_s26  ;;  %660 = vrot.lane.b32.xlu0 %v655_v23, %s2370_s26  ;;  %v1634_v22 = vpack.i.b16 %v2207_v15, %v2207_v15  ;;  %v1641_v23 = vpack.i.b16 %v2208_v16, %v2208_v16  ;;  %v1886_v14 = vpack.i.b16 %v2219_v52, %v2219_v52 }
  0xdf   :  { %704 = vrot.lane.b32.xlu1 %v693_v35, %s2372_s30  ;;  %706 = vrot.lane.b32.xlu0 %v701_v36, %s2372_s30  ;;  %v1639_v35 = vrot.slane %v1634_v22, %v2428_v2  ;;  %v1646_v36 = vrot.slane %v1641_v23, %v2428_v2  ;;  %v1891_v23 = vrot.slane %v1886_v14, %v2434_v5 }
  0xe3   :  { %748 = vrot.lane.b32.xlu1 %v738_v41, %s2371_s27  ;;  %750 = vrot.lane.b32.xlu0 %v745_v42, %s2371_s27  ;;  %v2214_v41 = vcombine.high %v1761_v31, %v1761_v31  ;;  %v1833_v42 = vld [vmem:[%s3040_s1] sm:$0x44] }
  0xe4   :  { %v2217_v45 = vcombine.low %v1833_v42, %v1833_v42  ;;  %v2218_v50 = vcombine.high %v1833_v42, %v1833_v42 }
  0xe5   :  { %v1776_v49 = vshrl.u32 %v2214_v41, 16 }
  0xe6   :  { %v1840_v33 = vshrl.u32 %v2217_v45, 16 }
  0xe7   :  { %794 = vrot.lane.b32.xlu1 %v783_v46, %s2373_s7  ;;  %796 = vrot.lane.b32.xlu0 %v791_v48, %s2373_s7  ;;  %v1684_v46 = vrot.slane %v1679_v39, %v2428_v2  ;;  %v1692_v48 = vrot.slane %v1687_v40, %v2428_v2  ;;  %v1777_v56 = vpack.i.b16 %v1776_v49, %v1776_v49 }
  0xe8   :  { %v1841_v59 = vpack.i.b16 %v1840_v33, %v1840_v33 }
  0xeb   :  { %866 = vrot.lane.b32.xlu1 %v855_v57, %s2374_s14  ;;  %868 = vrot.lane.b32.xlu0 %v863_v51, %s2374_s14  ;;  %v1848_v57 = vshrl.u32 %v2218_v50, 16  ;;  %v1923_v51 = vld [vmem:[%s3040_s1] sm:$0x88] }
  0xec   :  { %v2221_v61 = vcombine.low %v1923_v51, %v1923_v51  ;;  %v2222_v7 = vcombine.high %v1923_v51, %v1923_v51 }
  0xee   :  { %v1930_v16 = vshrl.u32 %v2221_v61, 16 }
  0xef   :  { %910 = vrot.lane.b32.xlu1 %v900_v0, %s2375_s0  ;;  %912 = vrot.lane.b32.xlu0 %v907_v1, %s2375_s0  ;;  %v1782_v0 = vrot.slane %v1777_v56, %v2430_v3  ;;  %v1849_v1 = vpack.i.b16 %v1848_v57, %v1848_v57  ;;  %v1893_v3 = vpack.i.b16 %v2220_v60, %v2220_v60 }
  0xf0   :  { %v1931_v27 = vpack.i.b16 %v1930_v16, %v1930_v16 }
  0xf1   :  { %v1854_v15 = vrot.slane %v1849_v1, %v2432_v4 }
  0xf2   :  { %v1936_v38 = vrot.slane %v1931_v27, %v2434_v5 }
  0xf3   :  { %956 = vrot.lane.b32.xlu1 %v945_v13, %s2376_s19  ;;  %958 = vrot.lane.b32.xlu0 %v953_v17, %s2376_s19  ;;  %v1846_v13 = vrot.slane %v1841_v59, %v2432_v4  ;;  %v1938_v17 = vshrl.u32 %v2222_v7, 16 }
  0xf5   :  { %v1939_v29 = vpack.i.b16 %v1938_v17, %v1938_v17 }
  0xf7   :  { %1000 = vrot.lane.b32.xlu1 %v990_v25, %s2377_s20  ;;  %1002 = vrot.lane.b32.xlu0 %v997_v26, %s2377_s20  ;;  %v2224_v25 = vcombine.high %v1969_v18, %v1969_v18  ;;  %v1898_v26 = vrot.slane %v1893_v3, %v2434_v5  ;;  %v1944_v39 = vrot.slane %v1939_v29, %v2434_v5 }
  0xf9   :  { %v1983_v40 = vpack.i.b16 %v2224_v25, %v2224_v25 }
  0xfb   :  { %1649 = vrot.lane.b32.xlu1 %v1639_v35, %s2370_s26  ;;  %1651 = vrot.lane.b32.xlu0 %v1646_v36, %s2370_s26  ;;  %v1988_v45 = vrot.slane %v1983_v40, %v2428_v2 }
  0xff   :  { %1695 = vrot.lane.b32.xlu1 %v1684_v46, %s2372_s30  ;;  %1697 = vrot.lane.b32.xlu0 %v1692_v48, %s2372_s30 }
 0x103   :  { %1739 = vrot.lane.b32.xlu1 %v1729_v54, %s2371_s27  ;;  %1741 = vrot.lane.b32.xlu0 %v1736_v55, %s2371_s27 }
 0x107   :  { %1785 = vrot.lane.b32.xlu1 %v1774_v58, %s2373_s7  ;;  %1787 = vrot.lane.b32.xlu0 %v1782_v0, %s2373_s7 }
 0x109   :  { %v115_v8 = vpop.permute.xlu1 %114  ;;  %v113_v9 = vpop.permute.xlu0 %112 }
 0x10a   :  { %v117_v11 = vsel %vm39_vm3, %v113_v9, %v115_v8  ;;  %121 = vst.msk [vmem:[#allocation2] sm:$0xff] %vm120_vm12, %v113_v9  ;;  %v2278_v9 = vld [vmem:[%s3041_s2] ss:$8 sps:$4 sm:$0xff]  }
 0x10b   :  { %583 = vmatprep.subr.bf16.mxu0 %v117_v11  ;;  %1857 = vrot.lane.b32.xlu1 %v1846_v13, %s2374_s14 }
 0x10c   :  { %1859 = vrot.lane.b32.xlu0 %v1854_v15, %s2374_s14 }
 0x10d   :  { %v169_v19 = vpop.permute.xlu1 %168  ;;  %v171_v22 = vpop.permute.xlu0 %170 }
 0x10e   :  { %177 = vst.msk [vmem:[#allocation2 + $0x10] sm:$0xff] %vm176_vm13, %v169_v19  ;;  %v173_v36 = vsel %vm42_vm2, %v169_v19, %v171_v22 }
 0x10f   :  { %1901 = vrot.lane.b32.xlu1 %v1891_v23, %s2375_s0 }
 0x110   :  { %1903 = vrot.lane.b32.xlu0 %v1898_v26, %s2375_s0 }
 0x111   :  { %v225_v31 = vpop.permute.xlu1 %224  ;;  %v223_v34 = vpop.permute.xlu0 %222  ;;  %v543_v35 = vld [vmem:[#allocation2] sm:$0xff] }
 0x112   :  { %231 = vst.msk [vmem:[#allocation2 + $0x20] sm:$0xff] %vm230_vm14, %v223_v34  ;;  %584 = vmatpush1.bf16.msra.mxu0 %v543_v35  ;;  %v227_v44 = vsel %vm45_vm1, %v223_v34, %v225_v31 }
 0x113   :  { %585 = vmatprep.subr.bf16.mxu0 %v173_v36  ;;  %1947 = vrot.lane.b32.xlu1 %v1936_v38, %s2376_s19 }
 0x114   :  { %1949 = vrot.lane.b32.xlu0 %v1944_v39, %s2376_s19 }
 0x115   :  { %v281_v41 = vpop.permute.xlu1 %280  ;;  %v279_v42 = vpop.permute.xlu0 %278  ;;  %v545_v43 = vld [vmem:[#allocation2 + $0x10] sm:$0xff] }
 0x116   :  { %287 = vst.msk [vmem:[#allocation2 + $0x30] sm:$0xff] %vm286_vm15, %v279_v42  ;;  %586 = vmatpush1.bf16.msra.mxu0 %v545_v43  ;;  %v283_v49 = vsel %vm48_vm0, %v279_v42, %v281_v41 }
 0x117   :  { %587 = vmatprep.subr.bf16.mxu0 %v227_v44  ;;  %1991 = vrot.lane.b32.xlu1 %v1981_v30, %s2377_s20 }
 0x118   :  { %1993 = vrot.lane.b32.xlu0 %v1988_v45, %s2377_s20 }
 0x119   :  { %v378_v46 = vpop.permute.xlu1 %377  ;;  %v376_v5 = vpop.permute.xlu0 %375  ;;  %v547_v48 = vld [vmem:[#allocation2 + $0x20] sm:$0xff] }
 0x11a   :  { %384 = vst.msk [vmem:[#allocation2 + $0x58] sm:$0xff] %vm265_vm8, %v378_v46  ;;  %588 = vmatpush1.bf16.msra.mxu0 %v547_v48  ;;  %v379_v55 = vsel %vm265_vm8, %v376_v5, %v378_v46 }
 0x11b   :  { %589 = vmatprep.subr.bf16.mxu0 %v283_v49 }
 0x11d   :  { %v430_v50 = vpop.permute.xlu1 %429  ;;  %v428_v32 = vpop.permute.xlu0 %427  ;;  %v549_v33 = vld [vmem:[#allocation2 + $0x30] sm:$0xff] }
 0x11e   :  { %436 = vst.msk [vmem:[#allocation2 + $0x68] sm:$0xff] %vm209_vm5, %v430_v50  ;;  %590 = vmatpush1.bf16.msra.mxu0 %v549_v33 }
 0x11f   :  { %591 = vmatprep.subr.bf16.mxu0 %v2116_v28  ;;  %v431_v28 = vsel %vm209_vm5, %v428_v32, %v430_v50 }
 0x121   :  { %v484_v2 = vpop.permute.xlu1 %483  ;;  %v482_v53 = vpop.permute.xlu0 %481  ;;  %v554_v54 = vld [vmem:[#allocation2 + $0x58] sm:$0xff] }
 0x122   :  { %490 = vst.msk [vmem:[#allocation2 + $0x78] sm:$0xff] %vm155_vm6, %v484_v2  ;;  %592 = vmatpush1.bf16.msra.mxu0 %v2115_v47  ;;  %v485_v20 = vsel %vm155_vm6, %v482_v53, %v484_v2 }
 0x123   :  { %593 = vmatprep.subr.bf16.mxu0 %v554_v54 }
 0x125   :  { %v536_v56 = vpop.permute.xlu1 %535  ;;  %v534_v57 = vpop.permute.xlu0 %533  ;;  %v556_v51 = vld [vmem:[#allocation2 + $0x68] sm:$0xff] }
 0x126   :  { %542 = vst.msk [vmem:[#allocation2 + $0x88] sm:$0xff] %vm99_vm4, %v536_v56  ;;  %594 = vmatpush1.bf16.msra.mxu0 %v379_v55  ;;  %v537_v1 = vsel %vm99_vm4, %v534_v57, %v536_v56 }
 0x127   :  { %595 = vmatprep.subr.bf16.mxu0 %v556_v51 }
 0x129   :  { %v1143_v52 = vpop.permute.xlu1 %1142  ;;  %v1141_v58 = vpop.permute.xlu0 %1140  ;;  %v558_v59 = vld [vmem:[#allocation2 + $0x78] sm:$0xff] }
 0x12a   :  { %v1144_v60 = vsel %vm39_vm3, %v1141_v58, %v1143_v52  ;;  %1147 = vst.msk [vmem:[#allocation2] sm:$0xff] %vm120_vm12, %v1141_v58  ;;  %596 = vmatpush1.bf16.msra.mxu0 %v431_v28 }
 0x12b   :  { %597 = vmatprep.subr.bf16.mxu0 %v558_v59 }
 0x12d   :  { %v1196_v21 = vpop.permute.xlu1 %1195  ;;  %v1194_v47 = vpop.permute.xlu0 %1193  ;;  %v560_v61 = vld [vmem:[#allocation2 + $0x88] sm:$0xff] }
 0x12e   :  { %v1197_v0 = vsel %vm42_vm2, %v1194_v47, %v1196_v21  ;;  %1200 = vst.msk [vmem:[#allocation2 + $0x10] sm:$0xff] %vm176_vm13, %v1194_v47  ;;  %598 = vmatpush1.bf16.msra.mxu0 %v485_v20 }
 0x12f   :  { %599 = vmatprep.subr.bf16.mxu0 %v560_v61 }
 0x131   :  { %v1247_v7 = vpop.permute.xlu1 %1246  ;;  %v1245_v8 = vpop.permute.xlu0 %1244  ;;  %v1556_v15 = vld [vmem:[#allocation2] sm:$0xff] }
 0x132   :  { %v1248_v11 = vsel %vm45_vm1, %v1245_v8, %v1247_v7  ;;  %1251 = vst.msk [vmem:[#allocation2 + $0x20] sm:$0xff] %vm230_vm14, %v1245_v8  ;;  %600 = vmatpush1.bf16.msra.mxu0 %v537_v1 }
 0x133   :  { %1574 = vmatprep.subr.bf16.mxu0 %v1144_v60 }
 0x135   :  { %v1300_v13 = vpop.permute.xlu1 %1299  ;;  %v1298_v14 = vpop.permute.xlu0 %1297  ;;  %616 = vmatmul.mubr.bf16.vlgmr.msra.gmra.mrb[0].mxu0 %v2278_v9  ;;  %v1558_v16 = vld [vmem:[#allocation2 + $0x10] sm:$0xff] }
 0x136   :  { %v1301_v3 = vsel %vm48_vm0, %v1298_v14, %v1300_v13  ;;  %1304 = vst.msk [vmem:[#allocation2 + $0x30] sm:$0xff] %vm286_vm15, %v1298_v14  ;;  %1575 = vmatpush1.bf16.msra.mxu0 %v1556_v15  ;;  %2206 = vmatprep.mubr.msk.bf16.mxu0 %vm42_vm2, %v2639_v6 }
 0x137   :  { %1576 = vmatprep.subr.bf16.mxu0 %v1197_v0 }
 0x139   :  { %v1395_v17 = vpop.permute.xlu1 %1394  ;;  %v1393_v18 = vpop.permute.xlu0 %1392  ;;  %v1560_v22 = vld [vmem:[#allocation2 + $0x20] sm:$0xff] }
 0x13a   :  { %1577 = vmatpush1.bf16.msra.mxu0 %v1558_v16  ;;  %1400 = vst.msk [vmem:[#allocation2 + $0x58] sm:$0xff] %vm265_vm8, %v1395_v17  ;;  %v1396_v19 = vsel %vm265_vm8, %v1393_v18, %v1395_v17 }
 0x13b   :  { %1578 = vmatprep.subr.bf16.mxu0 %v1248_v11 }
 0x13d   :  { %v1446_v23 = vpop.permute.xlu1 %1445  ;;  %v1444_v24 = vpop.permute.xlu0 %1443  ;;  %v1562_v6 = vld [vmem:[#allocation2 + $0x30] sm:$0xff] }
 0x13e   :  { %1579 = vmatpush1.bf16.msra.mxu0 %v1560_v22  ;;  %1451 = vst.msk [vmem:[#allocation2 + $0x68] sm:$0xff] %vm209_vm5, %v1446_v23  ;;  %v1447_v25 = vsel %vm209_vm5, %v1444_v24, %v1446_v23 }
 0x13f   :  { %1580 = vmatprep.subr.bf16.mxu0 %v1301_v3 }
 0x141   :  { %v1499_v26 = vpop.permute.xlu1 %1498  ;;  %v1497_v27 = vpop.permute.xlu0 %1496  ;;  %v1567_v31 = vld [vmem:[#allocation2 + $0x58] sm:$0xff] }
 0x142   :  { %1581 = vmatpush1.bf16.msra.mxu0 %v1562_v6  ;;  %1504 = vst.msk [vmem:[#allocation2 + $0x78] sm:$0xff] %vm155_vm6, %v1499_v26  ;;  %v1500_v29 = vsel %vm155_vm6, %v1497_v27, %v1499_v26 }
 0x143   :  { %1582 = vmatprep.subr.bf16.mxu0 %v2185_v10 }
 0x145   :  { %v1550_v34 = vpop.permute.xlu1 %1549  ;;  %v1548_v35 = vpop.permute.xlu0 %1547  ;;  %v1569_v37 = vld [vmem:[#allocation2 + $0x68] sm:$0xff] }
 0x146   :  { %1583 = vmatpush1.bf16.msra.mxu0 %v2184_v12  ;;  %1555 = vst.msk [vmem:[#allocation2 + $0x88] sm:$0xff] %vm99_vm4, %v1550_v34  ;;  %v1551_v36 = vsel %vm99_vm4, %v1548_v35, %v1550_v34  ;;  %v1807_v34 = vld [vmem:[%s3040_s1] sm:$0x44] }
 0x147   :  { %1584 = vmatprep.subr.bf16.mxu0 %v1567_v31 }
 0x149   :  { %v1571_v38 = vld [vmem:[#allocation2 + $0x78] sm:$0xff] }
 0x14a   :  { %1585 = vmatpush1.bf16.msra.mxu0 %v1396_v19 }
 0x14b   :  { %1586 = vmatprep.subr.bf16.mxu0 %v1569_v37 }
 0x14d   :  { %v1573_v39 = vld [vmem:[#allocation2 + $0x88] sm:$0xff] }
 0x14e   :  { %1587 = vmatpush1.bf16.msra.mxu0 %v1447_v25 }
 0x14f   :  { %1588 = vmatprep.subr.bf16.mxu0 %v1571_v38 }
 0x152   :  { %1589 = vmatpush1.bf16.msra.mxu0 %v1500_v29 }
 0x153   :  { %1590 = vmatprep.subr.bf16.mxu0 %v1573_v39 }
 0x156   :  { %1591 = vmatpush1.bf16.msra.mxu0 %v1551_v36  ;;  %v2850_v10 = vpop.permute.xlu1 %568  ;;  %v2852_v62 = vpop.permute.xlu0 %563 }
 0x159   :  { %1607 = vmatmul.mubr.bf16.vlgmr.msra.gmra.mrb[4].mxu0 %v2278_v9 }
 0x15a   :  { %v659_v63 = vpop.permute.xlu1 %658  ;;  %v661_v12 = vpop.permute.xlu0 %660 }
 0x15b   :  { %v662_v56 = vsel %vm99_vm4, %v659_v63, %v661_v12 }
 0x15e   :  { %v705_v40 = vpop.permute.xlu1 %704  ;;  %v707_v41 = vpop.permute.xlu0 %706 }
 0x15f   :  { %v708_v60 = vsel %vm155_vm6, %v705_v40, %v707_v41  ;;  %v2215_v40 = vcombine.low %v1807_v34, %v1807_v34 }
 0x162   :  { %v749_v42 = vpop.permute.xlu1 %748  ;;  %v751_v43 = vpop.permute.xlu0 %750 }
 0x163   :  { %v752_v61 = vsel %vm209_vm5, %v749_v42, %v751_v43 }
 0x166   :  { %v795_v44 = vpop.permute.xlu1 %794  ;;  %v797_v30 = vpop.permute.xlu0 %796 }
 0x167   :  { %v798_v9 = vsel %vm265_vm8, %v795_v44, %v797_v30 }
 0x16a   :  { %v867_v50 = vpop.permute.xlu1 %866  ;;  %v869_v2 = vpop.permute.xlu0 %868 }
 0x16b   :  { %v870_v16 = vsel %vm48_vm0, %v867_v50, %v869_v2 }
 0x16e   :  { %v911_v58 = vpop.permute.xlu1 %910  ;;  %v913_v20 = vpop.permute.xlu0 %912 }
 0x16f   :  { %v914_v23 = vsel %vm45_vm1, %v911_v58, %v913_v20 }
 0x172   :  { %v957_v1 = vpop.permute.xlu1 %956  ;;  %v959_v7 = vpop.permute.xlu0 %958 }
 0x173   :  { %v960_v6 = vsel %vm42_vm2, %v957_v1, %v959_v7 }
 0x176   :  { %v1001_v13 = vpop.permute.xlu1 %1000  ;;  %v1003_v15 = vpop.permute.xlu0 %1002 }
 0x177   :  { %v1004_v35 = vsel %vm39_vm3, %v1001_v13, %v1003_v15 }
 0x17a   :  { %v1650_v17 = vpop.permute.xlu1 %1649  ;;  %v1652_v19 = vpop.permute.xlu0 %1651 }
 0x17e   :  { %v1696_v26 = vpop.permute.xlu1 %1695  ;;  %v1698_v27 = vpop.permute.xlu0 %1697 }
 0x182   :  { %v1740_v38 = vpop.permute.xlu1 %1739  ;;  %v1742_v42 = vpop.permute.xlu0 %1741 }
 0x208   :  { %v617_v45 = vpop.f32.mrb[0].mxu0 }
 0x209   :  { %v618_v46 = vadd.f32 %v617_v45, %v2852_v62  ;;  %v619_v5 = vpop.f32.mrb[1].mxu0 }
 0x20a   :  { %v620_v48 = vadd.f32 %v619_v5, %v2852_v62  ;;  %v621_v49 = vpop.f32.mrb[2].mxu0 }
 0x20b   :  { %v622_v32 = vadd.f32 %v621_v49, %v2850_v10  ;;  %v623_v33 = vpop.f32.mrb[3].mxu0  ;;  %v626_v54 = vmax.f32 %v618_v46, 0.0 }
 0x20c   :  { %v624_v53 = vadd.f32 %v623_v33, %v2850_v10  ;;  %v627_v57 = vmax.f32 %v620_v48, 0.0 }
 0x20d   :  { %v628_v55 = vmax.f32 %v622_v32, 0.0  ;;  %v2912_v32 = vld [vmem:[%s3043_s4] sm:$0xff] }
 0x20e   :  { %v629_v51 = vmax.f32 %v624_v53, 0.0  ;;  %v2917_v53 = vcombine.high %v2912_v32, %v2912_v32 }
 0x20f   :  { %v2859_v28 = vpack.c.bf16 %v628_v55, %v626_v54  ;;  %v1786_v54 = vpop.permute.xlu1 %1785  ;;  %v1788_v55 = vpop.permute.xlu0 %1787 }
 0x210   :  { %v2861_v52 = vpack.c.bf16 %v629_v51, %v627_v57  ;;  %2160 = vmatprep.mubr.msk.bf16.mxu1 %vm42_vm2, %v2917_v53 }
 0x211   :  { %v665_v59 = vmul.bf16 %v662_v56, %v2859_v28  ;;  %v711_v47 = vmul.bf16 %v708_v60, %v2859_v28  ;;  %v755_v8 = vmul.bf16 %v752_v61, %v2859_v28  ;;  %v801_v14 = vmul.bf16 %v798_v9, %v2859_v28 }
 0x212   :  { %v666_v21 = vmul.bf16 %v661_v12, %v2861_v52  ;;  %v712_v0 = vmul.bf16 %v707_v41, %v2861_v52  ;;  %v756_v11 = vmul.bf16 %v751_v43, %v2861_v52  ;;  %v802_v3 = vmul.bf16 %v797_v30, %v2861_v52 }
 0x213   :  { %669 = vrot.lane.b32.xlu1 %v665_v59, %s2377_s20  ;;  %v873_v18 = vmul.bf16 %v867_v50, %v2859_v28  ;;  %v874_v22 = vmul.bf16 %v870_v16, %v2861_v52  ;;  %v917_v24 = vmul.bf16 %v911_v58, %v2859_v28  ;;  %v918_v25 = vmul.bf16 %v914_v23, %v2861_v52 }
 0x214   :  { %671 = vrot.lane.b32.xlu0 %v666_v21, %s2377_s20  ;;  %v963_v29 = vmul.bf16 %v957_v1, %v2859_v28  ;;  %v964_v31 = vmul.bf16 %v960_v6, %v2861_v52  ;;  %v1007_v37 = vmul.bf16 %v1001_v13, %v2859_v28  ;;  %v2216_v12 = vcombine.high %v1807_v34, %v1807_v34  ;;  %v1860_v1 = vpop.permute.xlu0 %1859 }
 0x215   :  { %v1008_v41 = vmul.bf16 %v1004_v35, %v2861_v52  ;;  %v1814_v50 = vpack.i.b16 %v2215_v40, %v2215_v40  ;;  %v1699_v59 = vsel %vm155_vm6, %v1696_v26, %v1698_v27  ;;  %v1743_v61 = vsel %vm209_vm5, %v1740_v38, %v1742_v42 }
 0x216   :  { %v1821_v49 = vpack.i.b16 %v2216_v12, %v2216_v12  ;;  %v1789_v9 = vsel %vm265_vm8, %v1786_v54, %v1788_v55 }
 0x217   :  { %715 = vrot.lane.b32.xlu1 %v711_v47, %s2376_s19  ;;  %v2930_v58 = vrot.slane %v1814_v50, %v2432_v4 }
 0x218   :  { %717 = vrot.lane.b32.xlu0 %v712_v0, %s2376_s19  ;;  %v2927_v51 = vrot.slane %v1821_v49, %v2432_v4  ;;  %v1858_v0 = vpop.permute.xlu1 %1857 }
 0x219   :  { %v1861_v16 = vsel %vm48_vm0, %v1858_v0, %v1860_v1 }
 0x21b   :  { %759 = vrot.lane.b32.xlu1 %v755_v8, %s2375_s0 }
 0x21c   :  { %761 = vrot.lane.b32.xlu0 %v756_v11, %s2375_s0  ;;  %v1902_v13 = vpop.permute.xlu1 %1901 }
 0x21f   :  { %805 = vrot.lane.b32.xlu1 %v801_v14, %s2374_s14  ;;  %v1904_v14 = vpop.permute.xlu0 %1903 }
 0x220   :  { %807 = vrot.lane.b32.xlu0 %v802_v3, %s2374_s14  ;;  %v1905_v23 = vsel %vm45_vm1, %v1902_v13, %v1904_v14 }
 0x223   :  { %877 = vrot.lane.b32.xlu1 %v873_v18, %s2373_s7  ;;  %v1948_v18 = vpop.permute.xlu1 %1947 }
 0x224   :  { %879 = vrot.lane.b32.xlu0 %v874_v22, %s2373_s7 }
 0x227   :  { %921 = vrot.lane.b32.xlu1 %v917_v24, %s2371_s27  ;;  %v1992_v26 = vpop.permute.xlu1 %1991 }
 0x228   :  { %923 = vrot.lane.b32.xlu0 %v918_v25, %s2371_s27 }
 0x22b   :  { %967 = vrot.lane.b32.xlu1 %v963_v29, %s2372_s30 }
 0x22c   :  { %v1608_v36 = vpop.f32.mrb[4].mxu0  ;;  %969 = vrot.lane.b32.xlu0 %v964_v31, %s2372_s30 }
 0x22d   :  { %v1609_v39 = vadd.f32 %v1608_v36, %v2852_v62  ;;  %v1610_v63 = vpop.f32.mrb[5].mxu0 }
 0x22e   :  { %v1611_v43 = vadd.f32 %v1610_v63, %v2852_v62  ;;  %v1612_v44 = vpop.f32.mrb[6].mxu0  ;;  %v1653_v62 = vsel %vm99_vm4, %v1650_v17, %v1652_v19 }
 0x22f   :  { %v1613_v30 = vadd.f32 %v1612_v44, %v2850_v10  ;;  %v1614_v45 = vpop.f32.mrb[7].mxu0  ;;  %1011 = vrot.lane.b32.xlu1 %v1007_v37, %s2370_s26  ;;  %v1617_v5 = vmax.f32 %v1609_v39, 0.0  ;;  %v68_v37 = vld [vmem:[%s3044_s5] sm:$0xff] }
 0x230   :  { %v1615_v46 = vadd.f32 %v1614_v45, %v2850_v10  ;;  %1013 = vrot.lane.b32.xlu0 %v1008_v41, %s2370_s26  ;;  %v1618_v33 = vmax.f32 %v1611_v43, 0.0  ;;  %v816_v41 = vld [vmem:[%s3040_s1] sm:$0x44]  ;;  %s2379_s1 = smov [#allocation8]  }
 0x231   :  { %v1619_v48 = vmax.f32 %v1613_v30, 0.0  ;;  %v2149_v44 = vcombine.high %v816_v41, %v816_v41  ;;  %s2080_s5 = sshll.u32 %s2379_s1, 4  ;;  %s2081_s5 = int_to_ptr.vmem [resolvable:$true] %s2080_s5 }
 0x232   :  { %v1620_v2 = vmax.f32 %v1615_v46, 0.0  ;;  %v2148_v46 = vcombine.low %v816_v41, %v816_v41  ;;  %p2346_p9 = scmp.lt.s32.totalorder %s2081_s5, %s2081_s5 }
 0x233   :  { %v2919_v10 = vpack.c.bf16 %v1619_v48, %v1617_v5  ;;  %v830_v49 = vpack.i.b16 %v2149_v44, %v2149_v44 }
 0x234   :  { %v2921_v56 = vpack.c.bf16 %v1620_v2, %v1618_v33  ;;  %v823_v33 = vpack.i.b16 %v2148_v46, %v2148_v46 }
 0x235   :  { %v1656_v57 = vmul.bf16 %v1653_v62, %v2919_v10  ;;  %v1702_v20 = vmul.bf16 %v1699_v59, %v2919_v10  ;;  %v1827_v47 = vmul.bf16 %v2930_v58, %v2919_v10  ;;  %v1746_v8 = vmul.bf16 %v1743_v61, %v2919_v10 }
 0x236   :  { %v1657_v60 = vmul.bf16 %v1652_v19, %v2921_v56  ;;  %v1828_v21 = vmul.bf16 %v2927_v51, %v2921_v56  ;;  %v1703_v7 = vmul.bf16 %v1698_v27, %v2921_v56  ;;  %v1747_v11 = vmul.bf16 %v1742_v42, %v2921_v56  ;;  %v1950_v19 = vpop.permute.xlu0 %1949 }
 0x237   :  { %1660 = vrot.lane.b32.xlu1 %v1656_v57, %s2377_s20  ;;  %v1792_v15 = vmul.bf16 %v1789_v9, %v2919_v10  ;;  %v1793_v3 = vmul.bf16 %v1788_v55, %v2921_v56  ;;  %v1864_v17 = vmul.bf16 %v1858_v0, %v2919_v10  ;;  %v1865_v22 = vmul.bf16 %v1861_v16, %v2921_v56 }
 0x238   :  { %1662 = vrot.lane.b32.xlu0 %v1657_v60, %s2377_s20  ;;  %v1908_v24 = vmul.bf16 %v1902_v13, %v2919_v10  ;;  %v1909_v25 = vmul.bf16 %v1905_v23, %v2921_v56  ;;  %v1951_v6 = vsel %vm42_vm2, %v1948_v18, %v1950_v19  ;;  %v1954_v29 = vmul.bf16 %v1948_v18, %v2919_v10 }
 0x239   :  { %v1955_v31 = vmul.bf16 %v1951_v6, %v2921_v56  ;;  %v1998_v35 = vmul.bf16 %v1992_v26, %v2919_v10  ;;  %v835_v55 = vrot.slane %v830_v49, %v2432_v4  ;;  %v828_v60 = vrot.slane %v823_v33, %v2432_v4 }
 0x23a   :  { %v1994_v27 = vpop.permute.xlu0 %1993 }
 0x23b   :  { %1706 = vrot.lane.b32.xlu1 %v1702_v20, %s2376_s19  ;;  %v1995_v34 = vsel %vm39_vm3, %v1992_v26, %v1994_v27  ;;  %v837_v0 = vmul.bf16 %v835_v55, %v2861_v52 }
 0x23c   :  { %1708 = vrot.lane.b32.xlu0 %v1703_v7, %s2376_s19  ;;  %v1999_v36 = vmul.bf16 %v1995_v34, %v2921_v56  ;;  %v836_v7 = vmul.bf16 %v828_v60, %v2859_v28 }
 0x23f   :  { %1750 = vrot.lane.b32.xlu1 %v1746_v8, %s2375_s0 }
 0x240   :  { %1752 = vrot.lane.b32.xlu0 %v1747_v11, %s2375_s0 }
 0x243   :  { %1796 = vrot.lane.b32.xlu1 %v1792_v15, %s2374_s14 }
 0x244   :  { %1798 = vrot.lane.b32.xlu0 %v1793_v3, %s2374_s14 }
 0x247   :  { %1868 = vrot.lane.b32.xlu1 %v1864_v17, %s2373_s7 }
 0x248   :  { %1870 = vrot.lane.b32.xlu0 %v1865_v22, %s2373_s7 }
 0x24b   :  { %1912 = vrot.lane.b32.xlu1 %v1908_v24, %s2371_s27  ;;  %v2158_v24 = vcombine.low %v2912_v32, %v2912_v32 }
 0x24c   :  { %1914 = vrot.lane.b32.xlu0 %v1909_v25, %s2371_s27 }
 0x24f   :  { %1958 = vrot.lane.b32.xlu1 %v1954_v29, %s2372_s30 }
 0x250   :  { %1960 = vrot.lane.b32.xlu0 %v1955_v31, %s2372_s30 }
 0x253   :  { %2002 = vrot.lane.b32.xlu1 %v1998_v35, %s2370_s26 }
 0x254   :  { %2004 = vrot.lane.b32.xlu0 %v1999_v36, %s2370_s26  ;;  %s2341_s26 = scalar_lea.vmem %s2081_s5, 512 }
 0x255   :  { %p2342_p8 = scmp.ne.s32.totalorder %s2081_s5, %s2341_s26  ;;  %p2347_p10 = scmp.lt.s32.totalorder %s2341_s26, %s2341_s26 }
 0x257   :  { %1040 = vperm.xlu1 %2241, %v68_v37   ;;  %p2348_p11 = por %p2347_p10, %p2346_p9 }
 0x259   :  { %p2349_p12 = pnand %p2348_p11, %p2342_p8 }
 0x285   :  { %v670_v38 = vpop.permute.xlu1 %669 }
 0x286   :  { %676 = vst.msk [vmem:[#allocation3] sm:$0xff] %vm120_vm12, %v670_v38  ;;  %v672_v39 = vpop.permute.xlu0 %671 }
 0x287   :  { %v673_v63 = vsel %vm39_vm3, %v670_v38, %v672_v39 }
 0x288   :  { %1052 = vmatprep.subr.bf16.mxu1 %v673_v63 }
 0x289   :  { %v716_v12 = vpop.permute.xlu1 %715 }
 0x28a   :  { %722 = vst.msk [vmem:[#allocation3 + $0x10] sm:$0xff] %vm176_vm13, %v716_v12  ;;  %v718_v40 = vpop.permute.xlu0 %717 }
 0x28b   :  { %v719_v30 = vsel %vm42_vm2, %v716_v12, %v718_v40 }
 0x28d   :  { %v760_v42 = vpop.permute.xlu1 %759  ;;  %v1020_v43 = vld [vmem:[#allocation3] sm:$0xff] }
 0x28e   :  { %766 = vst.msk [vmem:[#allocation3 + $0x20] sm:$0xff] %vm230_vm14, %v760_v42  ;;  %v762_v45 = vpop.permute.xlu0 %761  ;;  %1053 = vmatpush1.bf16.msra.mxu1 %v1020_v43 }
 0x28f   :  { %1054 = vmatprep.subr.bf16.mxu1 %v719_v30  ;;  %v763_v50 = vsel %vm45_vm1, %v760_v42, %v762_v45 }
 0x291   :  { %v806_v5 = vpop.permute.xlu1 %805  ;;  %v1022_v48 = vld [vmem:[#allocation3 + $0x10] sm:$0xff] }
 0x292   :  { %812 = vst.msk [vmem:[#allocation3 + $0x30] sm:$0xff] %vm286_vm15, %v806_v5  ;;  %v808_v62 = vpop.permute.xlu0 %807  ;;  %1055 = vmatpush1.bf16.msra.mxu1 %v1022_v48 }
 0x293   :  { %1056 = vmatprep.subr.bf16.mxu1 %v763_v50  ;;  %v809_v57 = vsel %vm48_vm0, %v806_v5, %v808_v62 }
 0x295   :  { %v878_v2 = vpop.permute.xlu1 %877  ;;  %v1024_v54 = vld [vmem:[#allocation3 + $0x20] sm:$0xff] }
 0x296   :  { %v880_v59 = vpop.permute.xlu0 %879  ;;  %1057 = vmatpush1.bf16.msra.mxu1 %v1024_v54 }
 0x297   :  { %885 = vst.msk [vmem:[#allocation3 + $0x58] sm:$0xff] %vm265_vm8, %v880_v59  ;;  %1058 = vmatprep.subr.bf16.mxu1 %v809_v57  ;;  %v881_v4 = vsel %vm265_vm8, %v878_v2, %v880_v59 }
 0x299   :  { %v922_v20 = vpop.permute.xlu1 %921  ;;  %v1026_v61 = vld [vmem:[#allocation3 + $0x30] sm:$0xff] }
 0x29a   :  { %v924_v1 = vpop.permute.xlu0 %923  ;;  %1059 = vmatpush1.bf16.msra.mxu1 %v1026_v61 }
 0x29b   :  { %929 = vst.msk [vmem:[#allocation3 + $0x68] sm:$0xff] %vm209_vm5, %v924_v1  ;;  %1060 = vmatprep.subr.bf16.mxu1 %v837_v0  ;;  %v925_v52 = vsel %vm209_vm5, %v922_v20, %v924_v1 }
 0x29d   :  { %v968_v11 = vpop.permute.xlu1 %967 }
 0x29e   :  { %v970_v8 = vpop.permute.xlu0 %969  ;;  %1061 = vmatpush1.bf16.msra.mxu1 %v836_v7  ;;  %v1031_v9 = vld [vmem:[#allocation3 + $0x58] sm:$0xff] }
 0x29f   :  { %975 = vst.msk [vmem:[#allocation3 + $0x78] sm:$0xff] %vm155_vm6, %v970_v8  ;;  %1062 = vmatprep.subr.bf16.mxu1 %v1031_v9  ;;  %v971_v3 = vsel %vm155_vm6, %v968_v11, %v970_v8 }
 0x2a1   :  { %v1012_v15 = vpop.permute.xlu1 %1011 }
 0x2a2   :  { %v1014_v13 = vpop.permute.xlu0 %1013  ;;  %1063 = vmatpush1.bf16.msra.mxu1 %v881_v4  ;;  %v1033_v14 = vld [vmem:[#allocation3 + $0x68] sm:$0xff] }
 0x2a3   :  { %1019 = vst.msk [vmem:[#allocation3 + $0x88] sm:$0xff] %vm99_vm4, %v1014_v13  ;;  %1064 = vmatprep.subr.bf16.mxu1 %v1033_v14  ;;  %v1015_v22 = vsel %vm99_vm4, %v1012_v15, %v1014_v13 }
 0x2a6   :  { %1065 = vmatpush1.bf16.msra.mxu1 %v925_v52  ;;  %v1035_v28 = vld [vmem:[#allocation3 + $0x78] sm:$0xff] }
 0x2a7   :  { %1066 = vmatprep.subr.bf16.mxu1 %v1035_v28 }
 0x2a9   :  { %v1661_v16 = vpop.permute.xlu1 %1660 }
 0x2aa   :  { %1667 = vst.msk [vmem:[#allocation3] sm:$0xff] %vm120_vm12, %v1661_v16  ;;  %v1663_v17 = vpop.permute.xlu0 %1662  ;;  %1067 = vmatpush1.bf16.msra.mxu1 %v971_v3  ;;  %v1037_v18 = vld [vmem:[#allocation3 + $0x88] sm:$0xff] }
 0x2ab   :  { %v1664_v19 = vsel %vm39_vm3, %v1661_v16, %v1663_v17  ;;  %1068 = vmatprep.subr.bf16.mxu1 %v1037_v18 }
 0x2ad   :  { %v1707_v23 = vpop.permute.xlu1 %1706 }
 0x2ae   :  { %1713 = vst.msk [vmem:[#allocation3 + $0x10] sm:$0xff] %vm176_vm13, %v1707_v23  ;;  %v1709_v25 = vpop.permute.xlu0 %1708  ;;  %1069 = vmatpush1.bf16.msra.mxu1 %v1015_v22 }
 0x2af   :  { %v1710_v6 = vsel %vm42_vm2, %v1707_v23, %v1709_v25  ;;  %2029 = vmatprep.subr.bf16.mxu1 %v1664_v19 }
 0x2b1   :  { %v1751_v26 = vpop.permute.xlu1 %1750  ;;  %1085 = vmatmul.mubr.bf16.vlgmr.msra.gmra.mrb[0].mxu1 %v2158_v24  ;;  %v2011_v27 = vld [vmem:[#allocation3] sm:$0xff] }
 0x2b2   :  { %1757 = vst.msk [vmem:[#allocation3 + $0x20] sm:$0xff] %vm230_vm14, %v1751_v26  ;;  %v1753_v29 = vpop.permute.xlu0 %1752  ;;  %2030 = vmatpush1.bf16.msra.mxu1 %v2011_v27  ;;  %2225 = vmatprep.mubr.msk.bf16.mxu1 %vm42_vm2, %v2917_v53 }
 0x2b3   :  { %v1754_v31 = vsel %vm45_vm1, %v1751_v26, %v1753_v29  ;;  %2031 = vmatprep.subr.bf16.mxu1 %v1710_v6 }
 0x2b5   :  { %v1797_v32 = vpop.permute.xlu1 %1796  ;;  %v2013_v34 = vld [vmem:[#allocation3 + $0x10] sm:$0xff] }
 0x2b6   :  { %1803 = vst.msk [vmem:[#allocation3 + $0x30] sm:$0xff] %vm286_vm15, %v1797_v32  ;;  %v1799_v35 = vpop.permute.xlu0 %1798  ;;  %2032 = vmatpush1.bf16.msra.mxu1 %v2013_v34 }
 0x2b7   :  { %v1800_v36 = vsel %vm48_vm0, %v1797_v32, %v1799_v35  ;;  %2033 = vmatprep.subr.bf16.mxu1 %v1754_v31 }
 0x2b9   :  { %v1869_v37 = vpop.permute.xlu1 %1868  ;;  %v2015_v38 = vld [vmem:[#allocation3 + $0x20] sm:$0xff] }
 0x2ba   :  { %v1871_v39 = vpop.permute.xlu0 %1870  ;;  %2034 = vmatpush1.bf16.msra.mxu1 %v2015_v38 }
 0x2bb   :  { %v1872_v63 = vsel %vm265_vm8, %v1869_v37, %v1871_v39  ;;  %1876 = vst.msk [vmem:[#allocation3 + $0x58] sm:$0xff] %vm265_vm8, %v1871_v39  ;;  %2035 = vmatprep.subr.bf16.mxu1 %v1800_v36 }
 0x2bd   :  { %v1913_v53 = vpop.permute.xlu1 %1912  ;;  %v2017_v12 = vld [vmem:[#allocation3 + $0x30] sm:$0xff] }
 0x2be   :  { %v1915_v40 = vpop.permute.xlu0 %1914  ;;  %2036 = vmatpush1.bf16.msra.mxu1 %v2017_v12 }
 0x2bf   :  { %v1916_v41 = vsel %vm209_vm5, %v1913_v53, %v1915_v40  ;;  %1920 = vst.msk [vmem:[#allocation3 + $0x68] sm:$0xff] %vm209_vm5, %v1915_v40  ;;  %2037 = vmatprep.subr.bf16.mxu1 %v1828_v21 }
 0x2c1   :  { %v1959_v42 = vpop.permute.xlu1 %1958 }
 0x2c2   :  { %v1961_v43 = vpop.permute.xlu0 %1960  ;;  %2038 = vmatpush1.bf16.msra.mxu1 %v1827_v47  ;;  %v2022_v44 = vld [vmem:[#allocation3 + $0x58] sm:$0xff] }
 0x2c3   :  { %v1962_v30 = vsel %vm155_vm6, %v1959_v42, %v1961_v43  ;;  %1966 = vst.msk [vmem:[#allocation3 + $0x78] sm:$0xff] %vm155_vm6, %v1961_v43  ;;  %2039 = vmatprep.subr.bf16.mxu1 %v2022_v44 }
 0x2c5   :  { %v2003_v45 = vpop.permute.xlu1 %2002 }
 0x2c6   :  { %v2005_v46 = vpop.permute.xlu0 %2004  ;;  %2040 = vmatpush1.bf16.msra.mxu1 %v1872_v63  ;;  %v2024_v5 = vld [vmem:[#allocation3 + $0x68] sm:$0xff] }
 0x2c7   :  { %v2006_v48 = vsel %vm99_vm4, %v2003_v45, %v2005_v46  ;;  %2010 = vst.msk [vmem:[#allocation3 + $0x88] sm:$0xff] %vm99_vm4, %v2005_v46  ;;  %2041 = vmatprep.subr.bf16.mxu1 %v2024_v5 }
 0x2ca   :  { %2042 = vmatpush1.bf16.msra.mxu1 %v1916_v41  ;;  %v2026_v56 = vld [vmem:[#allocation3 + $0x78] sm:$0xff] }
 0x2cb   :  { %2043 = vmatprep.subr.bf16.mxu1 %v2026_v56 }
 0x2ce   :  { %2044 = vmatpush1.bf16.msra.mxu1 %v1962_v30  ;;  %v2028_v10 = vld [vmem:[#allocation3 + $0x88] sm:$0xff] }
 0x2cf   :  { %2045 = vmatprep.subr.bf16.mxu1 %v2028_v10 }
 0x2d2   :  { %2046 = vmatpush1.bf16.msra.mxu1 %v2006_v48 }
 0x2d5   :  { %2062 = vmatmul.mubr.bf16.vlgmr.msra.gmra.mrb[4].mxu1 %v2158_v24 }
 0x2d6   :  { %v1041_v51 = vpop.permute.xlu1 %1040 }
 0x384   :  { %v1086_v58 = vpop.f32.mrb[0].mxu1 }
 0x385   :  { %v1087_v21 = vadd.f32 %v1086_v58, %v1041_v51  ;;  %v1088_v47 = vpop.f32.mrb[1].mxu1 }
 0x386   :  { %v1089_v49 = vadd.f32 %v1088_v47, %v1041_v51  ;;  %v1090_v50 = vpop.f32.mrb[2].mxu1 }
 0x387   :  { %v1093_v62 = vmax.f32 %v1087_v21, 0.0  ;;  %v1091_v33 = vpop.f32.mrb[3].mxu1 }
 0x388   :  { %v1094_v2 = vmax.f32 %v1089_v49, 0.0 }
 0x389   :  { %1095 = vst [vmem:[#allocation8] sm:$0xff] %v1093_v62 }
 0x38a   :  { %1096 = vst [vmem:[#allocation8 + $0x8] sm:$0xff] %v1094_v2 }
 0x3a8   :  { %v2063_v54 = vpop.f32.mrb[4].mxu1 }
 0x3a9   :  { %v2064_v55 = vadd.f32 %v2063_v54, %v1041_v51  ;;  %v2065_v57 = vpop.f32.mrb[5].mxu1 }
 0x3aa   :  { %v2066_v59 = vadd.f32 %v2065_v57, %v1041_v51  ;;  %v2067_v60 = vpop.f32.mrb[6].mxu1 }
 0x3ab   :  { %v2070_v20 = vmax.f32 %v2064_v55, 0.0  ;;  %v2068_v61 = vpop.f32.mrb[7].mxu1 }
 0x3ac   :  { %v2071_v0 = vmax.f32 %v2066_v59, 0.0 }
 0x3ad   :  { %2073 = vst [vmem:[#allocation8 + $0x10] sm:$0xff] %v2070_v20 }
 0x3ae   :  { %2074 = vst [vmem:[#allocation8 + $0x18] sm:$0xff] %v2071_v0 }
 0x3af   :  { %2352 = shalt.err (!%p2349_p12)
}
 0x3b0   :  { %s2353_s20 = scalar_lea.hbm %s3045_s6, 512 }
 0x3b1   :  { %p2354_p13 = scmp.ne.s32.totalorder %s3045_s6, %s2353_s20  ;;  %p2357_p0 = scmp.lt.u32.totalorder %s2353_s20, %s3045_s6 }
 0x3b3   :  { %p2359_p1 = pnand %p2357_p0, %p2354_p13 }
 0x3b5   :  { %2362 = shalt.err (!%p2359_p1)
}
 0x3b6   :  { %s2380_s23 = smov 256  }
 0x3b7   :  { %2086 = dma.vmem_to_hbm [thread:$0]  %s2081_s5, 512, %s3045_s6, [#allocation7], %s2380_s23, %s2380_s23, %s2376_s19  }
 0x3b8   :  { %2365 = dma.done.wait [#allocation7], 512  }
 0x3b9   :  { %2366 = vsyncadd [#allocation7], 4294966784 }
 0x3ba   :  { %2090 = vsyncpa [#allocation6], 1 }
 0x3bb   :  { %2091 = vsyncpa [#allocation7], 1 }

</bundles_post_ra>
